<compile_context>
chip_gen: v6e
topology: v6e:2x2x1
jax: 0.10.0
libtpu: 0.0.40
codegen_flags: <defaults>
</compile_context>

<pallas_src>
import functools

import numpy as np
import jax
import jax.numpy as jnp
from jax.experimental import pallas as pl
from jax.experimental.pallas import tpu as pltpu


def _resblock_kernel(W, x_ref, w1_ref, w2_ref, mask_ref, alpha_ref, o_ref, col_ref):
    # x_ref    : (1, C, S)  input block, channels-first, spatial flattened (S = H*W)
    # w*_ref   : (C, 9*C)   conv weights as (Cout, kh*kw*Cin), f32
    # mask_ref : (9, S)     f32 0/1 boundary masks, one row per 3x3 tap
    # alpha_ref: (1, 1)     f32 in SMEM -- shared PReLU slope
    # o_ref    : (1, C, S)
    # col_ref  : (9*C, S)   f32 VMEM scratch -- im2col operand, reused by both convs
    C = x_ref.shape[1]
    S = x_ref.shape[2]
    alpha = alpha_ref[0, 0]

    def build_im2col(act):
        # act: (C, S) f32.  Write the 9 shifted, border-zeroed copies into
        # col_ref rows [t*C, (t+1)*C) -- sublane-aligned, lane-dense stores.
        for kh in range(3):
            for kw in range(3):
                dy, dx = kh - 1, kw - 1
                t = kh * 3 + kw
                if dy == 0 and dx == 0:
                    tap = act
                else:
                    # shifted[s] = act[s + dy*W + dx]; values that wrapped across
                    # the image border are zeroed by the precomputed mask -- this
                    # IS the conv's zero padding (no padded scratch anywhere).
                    tap = pltpu.roll(act, shift=(-(dy * W + dx)) % S, axis=1)
                    tap = tap * mask_ref[t:t + 1, :]
                col_ref[t * C:(t + 1) * C, :] = tap

    def conv(w_ref):
        # One MXU matmul per conv: (Cout, 9*Cin) @ (9*Cin, S) -> (Cout, S), f32 acc.
        return jnp.dot(w_ref[...], col_ref[...], preferred_element_type=jnp.float32)

    # conv1 + PReLU
    build_im2col(x_ref[0].astype(jnp.float32))
    y = conv(w1_ref)
    y = jnp.where(y >= 0, y, alpha * y)

    # conv2 sees PReLU(conv1(x)) zero-padded by 1 -- exactly what PyTorch does.
    build_im2col(y)
    y = conv(w2_ref)

    # Residual add straight from the input ref; cast only at the store.
    o_ref[0] = (y + x_ref[0].astype(jnp.float32)).astype(o_ref.dtype)


def _pick_vmem_limit(per_step_bytes):
    """Only raise the scoped-VMEM limit when this kernel actually needs more, and
    always leave ~25% of physical VMEM (64 MiB/TC on v7x, 128 MiB on v5e/v6e)
    as headroom for compiler-internal scratch."""
    try:
        physical = pltpu.get_tpu_info().vmem_capacity_bytes
    except Exception:  # query unavailable: assume the smallest (v7x per-TC) VMEM
        physical = 64 * 1024 * 1024
    if per_step_bytes <= 16 * 1024 * 1024:
        return None  # default limit is plenty for small blocks
    return int(min(per_step_bytes * 5 // 4, physical * 3 // 4))


def _tap_masks(H, W):
    """(9, H*W) f32 0/1 masks: mask[t, s]=1 iff the 3x3 tap t at output pixel s
    reads an in-image pixel (0 => the conv's zero padding)."""
    s = np.arange(H * W)
    h, w = s // W, s % W
    m = np.ones((9, H * W), np.float32)
    for kh in range(3):
        for kw in range(3):
            dy, dx = kh - 1, kw - 1
            valid = (h + dy >= 0) & (h + dy < H) & (w + dx >= 0) & (w + dx < W)
            m[kh * 3 + kw] = valid.astype(np.float32)
    return m


@jax.jit
def resblock_forward(x_nchw, w1_oihw, w2_oihw, alpha):
    """x: (N, C, H, W) like PyTorch; w1/w2: (C, C, 3, 3) OIHW; alpha: PReLU scalar."""
    N, C, H, W = x_nchw.shape
    S = H * W

    # NCHW is already the kernel's layout once spatial dims are flattened (free).
    x = x_nchw.reshape(N, C, S)
    # (O, I, kh, kw) -> (O, kh, kw, I) -> (O, 9*I): one matmul per conv.
    w1 = jnp.transpose(w1_oihw, (0, 2, 3, 1)).reshape(C, 9 * C).astype(jnp.float32)
    w2 = jnp.transpose(w2_oihw, (0, 2, 3, 1)).reshape(C, 9 * C).astype(jnp.float32)
    masks = jnp.asarray(_tap_masks(H, W))
    alpha2 = jnp.asarray(alpha, jnp.float32).reshape(1, 1)

    itemsize = jnp.dtype(x_nchw.dtype).itemsize
    per_step = (2 * 2 * C * S * itemsize      # double-buffered in + out blocks
                + 2 * 2 * 9 * C * C * 4       # double-buffered weights (both convs)
                + 2 * 9 * S * 4               # double-buffered boundary masks
                + 9 * C * S * 4               # im2col scratch
                + 4 * C * S * 4)              # f32 temporaries headroom

    out = pl.pallas_call(
        functools.partial(_resblock_kernel, W),
        out_shape=jax.ShapeDtypeStruct((N, C, S), x_nchw.dtype),
        grid_spec=pltpu.PrefetchScalarGridSpec(
            num_scalar_prefetch=0,
            grid=(N,),
            in_specs=[
                pl.BlockSpec((1, C, S), lambda n: (n, 0, 0)),
                pl.BlockSpec((C, 9 * C), lambda n: (0, 0)),   # resident weights
                pl.BlockSpec((C, 9 * C), lambda n: (0, 0)),
                pl.BlockSpec((9, S), lambda n: (0, 0)),       # resident masks
                pl.BlockSpec(memory_space=pltpu.MemorySpace.SMEM),
            ],
            out_specs=pl.BlockSpec((1, C, S), lambda n: (n, 0, 0)),
            scratch_shapes=[pltpu.VMEM((9 * C, S), jnp.float32)],
        ),
        compiler_params=pltpu.CompilerParams(
            dimension_semantics=("parallel",),
            vmem_limit_bytes=_pick_vmem_limit(per_step),
        ),
    )(x, w1, w2, masks, alpha2)

    return out.reshape(N, C, H, W)


def resblock_ref(x, w1, w2, alpha):
    """Pure-JAX reference matching the PyTorch module (NCHW / OIHW)."""
    dn = ("NCHW", "OIHW", "NCHW")
    y = jax.lax.conv_general_dilated(
        x, w1, window_strides=(1, 1), padding=((1, 1), (1, 1)),
        dimension_numbers=dn, precision=jax.lax.Precision.HIGHEST)
    y = jnp.where(y >= 0, y, alpha * y)
    y = jax.lax.conv_general_dilated(
        y, w2, window_strides=(1, 1), padding=((1, 1), (1, 1)),
        dimension_numbers=dn, precision=jax.lax.Precision.HIGHEST)
    return y + x


if __name__ == "__main__":
    key = jax.random.PRNGKey(0)
    k1, k2, k3 = jax.random.split(key, 3)

    # resblock(dim) with dim=32, batch=2, 16x16 spatial.
    N, C, H, W = 2, 32, 16, 16
    x = jax.random.normal(k1, (N, C, H, W), dtype=jnp.float32)
    fan_in = C * 3 * 3
    w1 = jax.random.normal(k2, (C, C, 3, 3), dtype=jnp.float32) / jnp.sqrt(fan_in)
    w2 = jax.random.normal(k3, (C, C, 3, 3), dtype=jnp.float32) / jnp.sqrt(fan_in)
    alpha = jnp.float32(0.25)  # nn.PReLU() default init (single shared parameter)

    out = resblock_forward(x, w1, w2, alpha)
    out = jax.block_until_ready(out)

    ref = resblock_ref(x, w1, w2, alpha)
    assert out.shape == x.shape and out.dtype == x.dtype
    max_err = float(jnp.max(jnp.abs(out - ref)))
    assert jnp.allclose(out, ref, atol=2e-3, rtol=2e-3), max_err

    print("KERNEL_OK")
</pallas_src>

<mosaic_0001>
module attributes {stable_mosaic.version = 11 : i64} {
  func.func @_resblock_kernel(%arg0: i32, %arg1: memref<1x32x256xf32, #tpu.memory_space<vmem>>, %arg2: memref<32x288xf32, #tpu.memory_space<vmem>>, %arg3: memref<32x288xf32, #tpu.memory_space<vmem>>, %arg4: memref<9x256xf32, #tpu.memory_space<vmem>>, %arg5: memref<1x1xf32, #tpu.memory_space<smem>>, %arg6: memref<1x32x256xf32, #tpu.memory_space<vmem>>, %arg7: memref<288x256xf32, #tpu.memory_space<vmem>>) attributes {dimension_semantics = [#tpu.dimension_semantics<parallel>], iteration_bounds = array<i64: 2>, scalar_prefetch = 0 : i64, scratch_operands = 1 : i64, tpu.core_type = #tpu.core_type<tc>, window_params = [{transform_indices = @transform_0, window_bounds = array<i64: 1, 32, 256>}, {pipeline_mode = #tpu.pipeline_mode<synchronous>, transform_indices = @transform_1, window_bounds = array<i64: 32, 288>}, {pipeline_mode = #tpu.pipeline_mode<synchronous>, transform_indices = @transform_2, window_bounds = array<i64: 32, 288>}, {pipeline_mode = #tpu.pipeline_mode<synchronous>, transform_indices = @transform_3, window_bounds = array<i64: 9, 256>}, {transform_indices = @transform_4, window_bounds = array<i64: 1, 1>}, {transform_indices = @transform_5, window_bounds = array<i64: 1, 32, 256>}]} {
    %c0 = arith.constant 0 : index
    %c0_0 = arith.constant 0 : index
    %0 = memref.load %arg5[%c0, %c0_0] : memref<1x1xf32, #tpu.memory_space<smem>>
    %c0_1 = arith.constant 0 : index
    %c0_2 = arith.constant 0 : index
    %c0_3 = arith.constant 0 : index
    %1 = vector.load %arg1[%c0_1, %c0_2, %c0_3] : memref<1x32x256xf32, #tpu.memory_space<vmem>>, vector<1x32x256xf32>
    %2 = vector.shape_cast %1 : vector<1x32x256xf32> to vector<32x256xf32>
    %c17_i32 = arith.constant 17 : i32
    %3 = tpu.dynamic_rotate %2 by %c17_i32 dim 1 : vector<32x256xf32>, i32 -> vector<32x256xf32>
    %c0_4 = arith.constant 0 : index
    %c0_5 = arith.constant 0 : index
    %4 = vector.load %arg4[%c0_4, %c0_5] : memref<9x256xf32, #tpu.memory_space<vmem>>, vector<1x256xf32>
    %5 = vector.broadcast %4 : vector<1x256xf32> to vector<32x256xf32>
    %6 = arith.mulf %3, %5 : vector<32x256xf32>
    %c0_6 = arith.constant 0 : index
    %c0_7 = arith.constant 0 : index
    %7 = vector.load %arg7[%c0_6, %c0_7] : memref<288x256xf32, #tpu.memory_space<vmem>>, vector<32x256xf32>
    tpu.vector_store %arg7[%c0_6, %c0_7], %6 {strides = array<i32>} : memref<288x256xf32, #tpu.memory_space<vmem>>, vector<32x256xf32>,
    %c16_i32 = arith.constant 16 : i32
    %8 = tpu.dynamic_rotate %2 by %c16_i32 dim 1 : vector<32x256xf32>, i32 -> vector<32x256xf32>
    %c1 = arith.constant 1 : index
    %c0_8 = arith.constant 0 : index
    %9 = vector.load %arg4[%c1, %c0_8] : memref<9x256xf32, #tpu.memory_space<vmem>>, vector<1x256xf32>
    %10 = vector.broadcast %9 : vector<1x256xf32> to vector<32x256xf32>
    %11 = arith.mulf %8, %10 : vector<32x256xf32>
    %c32 = arith.constant 32 : index
    %c0_9 = arith.constant 0 : index
    %12 = vector.load %arg7[%c32, %c0_9] : memref<288x256xf32, #tpu.memory_space<vmem>>, vector<32x256xf32>
    tpu.vector_store %arg7[%c32, %c0_9], %11 {strides = array<i32>} : memref<288x256xf32, #tpu.memory_space<vmem>>, vector<32x256xf32>,
    %c15_i32 = arith.constant 15 : i32
    %13 = tpu.dynamic_rotate %2 by %c15_i32 dim 1 : vector<32x256xf32>, i32 -> vector<32x256xf32>
    %c2 = arith.constant 2 : index
    %c0_10 = arith.constant 0 : index
    %14 = vector.load %arg4[%c2, %c0_10] : memref<9x256xf32, #tpu.memory_space<vmem>>, vector<1x256xf32>
    %15 = vector.broadcast %14 : vector<1x256xf32> to vector<32x256xf32>
    %16 = arith.mulf %13, %15 : vector<32x256xf32>
    %c64 = arith.constant 64 : index
    %c0_11 = arith.constant 0 : index
    %17 = vector.load %arg7[%c64, %c0_11] : memref<288x256xf32, #tpu.memory_space<vmem>>, vector<32x256xf32>
    tpu.vector_store %arg7[%c64, %c0_11], %16 {strides = array<i32>} : memref<288x256xf32, #tpu.memory_space<vmem>>, vector<32x256xf32>,
    %c1_i32 = arith.constant 1 : i32
    %18 = tpu.dynamic_rotate %2 by %c1_i32 dim 1 : vector<32x256xf32>, i32 -> vector<32x256xf32>
    %c3 = arith.constant 3 : index
    %c0_12 = arith.constant 0 : index
    %19 = vector.load %arg4[%c3, %c0_12] : memref<9x256xf32, #tpu.memory_space<vmem>>, vector<1x256xf32>
    %20 = vector.broadcast %19 : vector<1x256xf32> to vector<32x256xf32>
    %21 = arith.mulf %18, %20 : vector<32x256xf32>
    %c96 = arith.constant 96 : index
    %c0_13 = arith.constant 0 : index
    %22 = vector.load %arg7[%c96, %c0_13] : memref<288x256xf32, #tpu.memory_space<vmem>>, vector<32x256xf32>
    tpu.vector_store %arg7[%c96, %c0_13], %21 {strides = array<i32>} : memref<288x256xf32, #tpu.memory_space<vmem>>, vector<32x256xf32>,
    %c128 = arith.constant 128 : index
    %c0_14 = arith.constant 0 : index
    %23 = vector.load %arg7[%c128, %c0_14] : memref<288x256xf32, #tpu.memory_space<vmem>>, vector<32x256xf32>
    tpu.vector_store %arg7[%c128, %c0_14], %2 {strides = array<i32>} : memref<288x256xf32, #tpu.memory_space<vmem>>, vector<32x256xf32>,
    %c255_i32 = arith.constant 255 : i32
    %24 = tpu.dynamic_rotate %2 by %c255_i32 dim 1 : vector<32x256xf32>, i32 -> vector<32x256xf32>
    %c5 = arith.constant 5 : index
    %c0_15 = arith.constant 0 : index
    %25 = vector.load %arg4[%c5, %c0_15] : memref<9x256xf32, #tpu.memory_space<vmem>>, vector<1x256xf32>
    %26 = vector.broadcast %25 : vector<1x256xf32> to vector<32x256xf32>
    %27 = arith.mulf %24, %26 : vector<32x256xf32>
    %c160 = arith.constant 160 : index
    %c0_16 = arith.constant 0 : index
    %28 = vector.load %arg7[%c160, %c0_16] : memref<288x256xf32, #tpu.memory_space<vmem>>, vector<32x256xf32>
    tpu.vector_store %arg7[%c160, %c0_16], %27 {strides = array<i32>} : memref<288x256xf32, #tpu.memory_space<vmem>>, vector<32x256xf32>,
    %c241_i32 = arith.constant 241 : i32
    %29 = tpu.dynamic_rotate %2 by %c241_i32 dim 1 : vector<32x256xf32>, i32 -> vector<32x256xf32>
    %c6 = arith.constant 6 : index
    %c0_17 = arith.constant 0 : index
    %30 = vector.load %arg4[%c6, %c0_17] : memref<9x256xf32, #tpu.memory_space<vmem>>, vector<1x256xf32>
    %31 = vector.broadcast %30 : vector<1x256xf32> to vector<32x256xf32>
    %32 = arith.mulf %29, %31 : vector<32x256xf32>
    %c192 = arith.constant 192 : index
    %c0_18 = arith.constant 0 : index
    %33 = vector.load %arg7[%c192, %c0_18] : memref<288x256xf32, #tpu.memory_space<vmem>>, vector<32x256xf32>
    tpu.vector_store %arg7[%c192, %c0_18], %32 {strides = array<i32>} : memref<288x256xf32, #tpu.memory_space<vmem>>, vector<32x256xf32>,
    %c240_i32 = arith.constant 240 : i32
    %34 = tpu.dynamic_rotate %2 by %c240_i32 dim 1 : vector<32x256xf32>, i32 -> vector<32x256xf32>
    %c7 = arith.constant 7 : index
    %c0_19 = arith.constant 0 : index
    %35 = vector.load %arg4[%c7, %c0_19] : memref<9x256xf32, #tpu.memory_space<vmem>>, vector<1x256xf32>
    %36 = vector.broadcast %35 : vector<1x256xf32> to vector<32x256xf32>
    %37 = arith.mulf %34, %36 : vector<32x256xf32>
    %c224 = arith.constant 224 : index
    %c0_20 = arith.constant 0 : index
    %38 = vector.load %arg7[%c224, %c0_20] : memref<288x256xf32, #tpu.memory_space<vmem>>, vector<32x256xf32>
    tpu.vector_store %arg7[%c224, %c0_20], %37 {strides = array<i32>} : memref<288x256xf32, #tpu.memory_space<vmem>>, vector<32x256xf32>,
    %c239_i32 = arith.constant 239 : i32
    %39 = tpu.dynamic_rotate %2 by %c239_i32 dim 1 : vector<32x256xf32>, i32 -> vector<32x256xf32>
    %c8 = arith.constant 8 : index
    %c0_21 = arith.constant 0 : index
    %40 = vector.load %arg4[%c8, %c0_21] : memref<9x256xf32, #tpu.memory_space<vmem>>, vector<1x256xf32>
    %41 = vector.broadcast %40 : vector<1x256xf32> to vector<32x256xf32>
    %42 = arith.mulf %39, %41 : vector<32x256xf32>
    %c256 = arith.constant 256 : index
    %c0_22 = arith.constant 0 : index
    %43 = vector.load %arg7[%c256, %c0_22] : memref<288x256xf32, #tpu.memory_space<vmem>>, vector<32x256xf32>
    tpu.vector_store %arg7[%c256, %c0_22], %42 {strides = array<i32>} : memref<288x256xf32, #tpu.memory_space<vmem>>, vector<32x256xf32>,
    %c0_23 = arith.constant 0 : index
    %c0_24 = arith.constant 0 : index
    %44 = vector.load %arg2[%c0_23, %c0_24] : memref<32x288xf32, #tpu.memory_space<vmem>>, vector<32x288xf32>
    %c0_25 = arith.constant 0 : index
    %c0_26 = arith.constant 0 : index
    %45 = vector.load %arg7[%c0_25, %c0_26] : memref<288x256xf32, #tpu.memory_space<vmem>>, vector<288x256xf32>
    %cst = arith.constant dense<0.000000e+00> : vector<32x256xf32>
    %46 = tpu.matmul %44, %45, %cst {dimension_numbers = #tpu.dot_dimension_numbers<[1], [0], [0], [1], [0, 0, 1, 1], [], []>} : vector<32x288xf32>, vector<288x256xf32>, vector<32x256xf32> -> vector<32x256xf32>
    %cst_27 = arith.constant 0.000000e+00 : f32
    %47 = vector.broadcast %cst_27 : f32 to vector<32x256xf32>
    %48 = arith.cmpf oge, %46, %47 : vector<32x256xf32>
    %49 = vector.broadcast %0 : f32 to vector<32x256xf32>
    %50 = arith.mulf %49, %46 : vector<32x256xf32>
    %51 = arith.select %48, %46, %50 : vector<32x256xi1>, vector<32x256xf32>
    %c17_i32_28 = arith.constant 17 : i32
    %52 = tpu.dynamic_rotate %51 by %c17_i32_28 dim 1 : vector<32x256xf32>, i32 -> vector<32x256xf32>
    %c0_29 = arith.constant 0 : index
    %c0_30 = arith.constant 0 : index
    %53 = vector.load %arg4[%c0_29, %c0_30] : memref<9x256xf32, #tpu.memory_space<vmem>>, vector<1x256xf32>
    %54 = vector.broadcast %53 : vector<1x256xf32> to vector<32x256xf32>
    %55 = arith.mulf %52, %54 : vector<32x256xf32>
    %c0_31 = arith.constant 0 : index
    %c0_32 = arith.constant 0 : index
    %56 = vector.load %arg7[%c0_31, %c0_32] : memref<288x256xf32, #tpu.memory_space<vmem>>, vector<32x256xf32>
    tpu.vector_store %arg7[%c0_31, %c0_32], %55 {strides = array<i32>} : memref<288x256xf32, #tpu.memory_space<vmem>>, vector<32x256xf32>,
    %c16_i32_33 = arith.constant 16 : i32
    %57 = tpu.dynamic_rotate %51 by %c16_i32_33 dim 1 : vector<32x256xf32>, i32 -> vector<32x256xf32>
    %c1_34 = arith.constant 1 : index
    %c0_35 = arith.constant 0 : index
    %58 = vector.load %arg4[%c1_34, %c0_35] : memref<9x256xf32, #tpu.memory_space<vmem>>, vector<1x256xf32>
    %59 = vector.broadcast %58 : vector<1x256xf32> to vector<32x256xf32>
    %60 = arith.mulf %57, %59 : vector<32x256xf32>
    %c32_36 = arith.constant 32 : index
    %c0_37 = arith.constant 0 : index
    %61 = vector.load %arg7[%c32_36, %c0_37] : memref<288x256xf32, #tpu.memory_space<vmem>>, vector<32x256xf32>
    tpu.vector_store %arg7[%c32_36, %c0_37], %60 {strides = array<i32>} : memref<288x256xf32, #tpu.memory_space<vmem>>, vector<32x256xf32>,
    %c15_i32_38 = arith.constant 15 : i32
    %62 = tpu.dynamic_rotate %51 by %c15_i32_38 dim 1 : vector<32x256xf32>, i32 -> vector<32x256xf32>
    %c2_39 = arith.constant 2 : index
    %c0_40 = arith.constant 0 : index
    %63 = vector.load %arg4[%c2_39, %c0_40] : memref<9x256xf32, #tpu.memory_space<vmem>>, vector<1x256xf32>
    %64 = vector.broadcast %63 : vector<1x256xf32> to vector<32x256xf32>
    %65 = arith.mulf %62, %64 : vector<32x256xf32>
    %c64_41 = arith.constant 64 : index
    %c0_42 = arith.constant 0 : index
    %66 = vector.load %arg7[%c64_41, %c0_42] : memref<288x256xf32, #tpu.memory_space<vmem>>, vector<32x256xf32>
    tpu.vector_store %arg7[%c64_41, %c0_42], %65 {strides = array<i32>} : memref<288x256xf32, #tpu.memory_space<vmem>>, vector<32x256xf32>,
    %c1_i32_43 = arith.constant 1 : i32
    %67 = tpu.dynamic_rotate %51 by %c1_i32_43 dim 1 : vector<32x256xf32>, i32 -> vector<32x256xf32>
    %c3_44 = arith.constant 3 : index
    %c0_45 = arith.constant 0 : index
    %68 = vector.load %arg4[%c3_44, %c0_45] : memref<9x256xf32, #tpu.memory_space<vmem>>, vector<1x256xf32>
    %69 = vector.broadcast %68 : vector<1x256xf32> to vector<32x256xf32>
    %70 = arith.mulf %67, %69 : vector<32x256xf32>
    %c96_46 = arith.constant 96 : index
    %c0_47 = arith.constant 0 : index
    %71 = vector.load %arg7[%c96_46, %c0_47] : memref<288x256xf32, #tpu.memory_space<vmem>>, vector<32x256xf32>
    tpu.vector_store %arg7[%c96_46, %c0_47], %70 {strides = array<i32>} : memref<288x256xf32, #tpu.memory_space<vmem>>, vector<32x256xf32>,
    %c128_48 = arith.constant 128 : index
    %c0_49 = arith.constant 0 : index
    %72 = vector.load %arg7[%c128_48, %c0_49] : memref<288x256xf32, #tpu.memory_space<vmem>>, vector<32x256xf32>
    tpu.vector_store %arg7[%c128_48, %c0_49], %51 {strides = array<i32>} : memref<288x256xf32, #tpu.memory_space<vmem>>, vector<32x256xf32>,
    %c255_i32_50 = arith.constant 255 : i32
    %73 = tpu.dynamic_rotate %51 by %c255_i32_50 dim 1 : vector<32x256xf32>, i32 -> vector<32x256xf32>
    %c5_51 = arith.constant 5 : index
    %c0_52 = arith.constant 0 : index
    %74 = vector.load %arg4[%c5_51, %c0_52] : memref<9x256xf32, #tpu.memory_space<vmem>>, vector<1x256xf32>
    %75 = vector.broadcast %74 : vector<1x256xf32> to vector<32x256xf32>
    %76 = arith.mulf %73, %75 : vector<32x256xf32>
    %c160_53 = arith.constant 160 : index
    %c0_54 = arith.constant 0 : index
    %77 = vector.load %arg7[%c160_53, %c0_54] : memref<288x256xf32, #tpu.memory_space<vmem>>, vector<32x256xf32>
    tpu.vector_store %arg7[%c160_53, %c0_54], %76 {strides = array<i32>} : memref<288x256xf32, #tpu.memory_space<vmem>>, vector<32x256xf32>,
    %c241_i32_55 = arith.constant 241 : i32
    %78 = tpu.dynamic_rotate %51 by %c241_i32_55 dim 1 : vector<32x256xf32>, i32 -> vector<32x256xf32>
    %c6_56 = arith.constant 6 : index
    %c0_57 = arith.constant 0 : index
    %79 = vector.load %arg4[%c6_56, %c0_57] : memref<9x256xf32, #tpu.memory_space<vmem>>, vector<1x256xf32>
    %80 = vector.broadcast %79 : vector<1x256xf32> to vector<32x256xf32>
    %81 = arith.mulf %78, %80 : vector<32x256xf32>
    %c192_58 = arith.constant 192 : index
    %c0_59 = arith.constant 0 : index
    %82 = vector.load %arg7[%c192_58, %c0_59] : memref<288x256xf32, #tpu.memory_space<vmem>>, vector<32x256xf32>
    tpu.vector_store %arg7[%c192_58, %c0_59], %81 {strides = array<i32>} : memref<288x256xf32, #tpu.memory_space<vmem>>, vector<32x256xf32>,
    %c240_i32_60 = arith.constant 240 : i32
    %83 = tpu.dynamic_rotate %51 by %c240_i32_60 dim 1 : vector<32x256xf32>, i32 -> vector<32x256xf32>
    %c7_61 = arith.constant 7 : index
    %c0_62 = arith.constant 0 : index
    %84 = vector.load %arg4[%c7_61, %c0_62] : memref<9x256xf32, #tpu.memory_space<vmem>>, vector<1x256xf32>
    %85 = vector.broadcast %84 : vector<1x256xf32> to vector<32x256xf32>
    %86 = arith.mulf %83, %85 : vector<32x256xf32>
    %c224_63 = arith.constant 224 : index
    %c0_64 = arith.constant 0 : index
    %87 = vector.load %arg7[%c224_63, %c0_64] : memref<288x256xf32, #tpu.memory_space<vmem>>, vector<32x256xf32>
    tpu.vector_store %arg7[%c224_63, %c0_64], %86 {strides = array<i32>} : memref<288x256xf32, #tpu.memory_space<vmem>>, vector<32x256xf32>,
    %c239_i32_65 = arith.constant 239 : i32
    %88 = tpu.dynamic_rotate %51 by %c239_i32_65 dim 1 : vector<32x256xf32>, i32 -> vector<32x256xf32>
    %c8_66 = arith.constant 8 : index
    %c0_67 = arith.constant 0 : index
    %89 = vector.load %arg4[%c8_66, %c0_67] : memref<9x256xf32, #tpu.memory_space<vmem>>, vector<1x256xf32>
    %90 = vector.broadcast %89 : vector<1x256xf32> to vector<32x256xf32>
    %91 = arith.mulf %88, %90 : vector<32x256xf32>
    %c256_68 = arith.constant 256 : index
    %c0_69 = arith.constant 0 : index
    %92 = vector.load %arg7[%c256_68, %c0_69] : memref<288x256xf32, #tpu.memory_space<vmem>>, vector<32x256xf32>
    tpu.vector_store %arg7[%c256_68, %c0_69], %91 {strides = array<i32>} : memref<288x256xf32, #tpu.memory_space<vmem>>, vector<32x256xf32>,
    %c0_70 = arith.constant 0 : index
    %c0_71 = arith.constant 0 : index
    %93 = vector.load %arg3[%c0_70, %c0_71] : memref<32x288xf32, #tpu.memory_space<vmem>>, vector<32x288xf32>
    %c0_72 = arith.constant 0 : index
    %c0_73 = arith.constant 0 : index
    %94 = vector.load %arg7[%c0_72, %c0_73] : memref<288x256xf32, #tpu.memory_space<vmem>>, vector<288x256xf32>
    %cst_74 = arith.constant dense<0.000000e+00> : vector<32x256xf32>
    %95 = tpu.matmul %93, %94, %cst_74 {dimension_numbers = #tpu.dot_dimension_numbers<[1], [0], [0], [1], [0, 0, 1, 1], [], []>} : vector<32x288xf32>, vector<288x256xf32>, vector<32x256xf32> -> vector<32x256xf32>
    %c0_75 = arith.constant 0 : index
    %c0_76 = arith.constant 0 : index
    %c0_77 = arith.constant 0 : index
    %96 = vector.load %arg1[%c0_75, %c0_76, %c0_77] : memref<1x32x256xf32, #tpu.memory_space<vmem>>, vector<1x32x256xf32>
    %97 = vector.shape_cast %96 : vector<1x32x256xf32> to vector<32x256xf32>
    %98 = arith.addf %95, %97 : vector<32x256xf32>
    %c0_78 = arith.constant 0 : index
    %c0_79 = arith.constant 0 : index
    %c0_80 = arith.constant 0 : index
    %99 = vector.load %arg6[%c0_78, %c0_79, %c0_80] : memref<1x32x256xf32, #tpu.memory_space<vmem>>, vector<1x32x256xf32>
    %100 = vector.shape_cast %99 : vector<1x32x256xf32> to vector<32x256xf32>
    %101 = vector.shape_cast %98 : vector<32x256xf32> to vector<1x32x256xf32>
    tpu.vector_store %arg6[%c0_78, %c0_79, %c0_80], %101 {strides = array<i32>} : memref<1x32x256xf32, #tpu.memory_space<vmem>>, vector<1x32x256xf32>,
    return
  }
  func.func @transform_0(%arg0: i32) -> (i32, i32, i32) {
    %c0_i32 = arith.constant 0 : i32
    %c0_i32_0 = arith.constant 0 : i32
    %c0_i32_1 = arith.constant 0 : i32
    return %arg0, %c0_i32, %c0_i32_0 : i32, i32, i32
  }
  func.func @transform_1(%arg0: i32) -> (i32, i32) {
    %c0_i32 = arith.constant 0 : i32
    %c0_i32_0 = arith.constant 0 : i32
    %c0_i32_1 = arith.constant 0 : i32
    return %c0_i32, %c0_i32_0 : i32, i32
  }
  func.func @transform_2(%arg0: i32) -> (i32, i32) {
    %c0_i32 = arith.constant 0 : i32
    %c0_i32_0 = arith.constant 0 : i32
    %c0_i32_1 = arith.constant 0 : i32
    return %c0_i32, %c0_i32_0 : i32, i32
  }
  func.func @transform_3(%arg0: i32) -> (i32, i32) {
    %c0_i32 = arith.constant 0 : i32
    %c0_i32_0 = arith.constant 0 : i32
    %c0_i32_1 = arith.constant 0 : i32
    return %c0_i32, %c0_i32_0 : i32, i32
  }
  func.func @transform_4(%arg0: i32) -> (i32, i32) {
    %c0_i32 = arith.constant 0 : i32
    %c0_i32_0 = arith.constant 0 : i32
    %c0_i32_1 = arith.constant 0 : i32
    return %c0_i32, %c0_i32_0 : i32, i32
  }
  func.func @transform_5(%arg0: i32) -> (i32, i32, i32) {
    %c0_i32 = arith.constant 0 : i32
    %c0_i32_0 = arith.constant 0 : i32
    %c0_i32_1 = arith.constant 0 : i32
    return %arg0, %c0_i32, %c0_i32_0 : i32, i32, i32
  }
}

</mosaic_0001>

<bundles_post_ra>
// kernel: resblock_forward.1
= control target key start
LH: loop header
LB: loop body
LE: loop exit
PB: predicated region body
PF: predicated region fallthrough
CT: control target
= control target key end

     0   :  { %s1855_s20 = smov 0   ;;  %s2735_s0 = inlined_call_operand.vmem [shape: f32[2,32,256], index: 0, kind: input, shape index: {}]   ;;  %s2736_s1 = inlined_call_operand.vmem [shape: f32[32,288], index: 1, kind: input, shape index: {}]   ;;  %s2737_s2 = inlined_call_operand.vmem [shape: f32[32,288], index: 2, kind: input, shape index: {}]   ;;  %s2738_s3 = inlined_call_operand.vmem [shape: f32[9,256], index: 3, kind: input, shape index: {}]   ;;  %s2739_s4 = inlined_call_operand.<no memory space> [shape: f32[1,1], index: 4, kind: input, shape index: {}]   ;;  %s2740_s5 = inlined_call_operand.vmem [shape: f32[2,32,256], index: 5, kind: output, shape index: {}]  }
   0x1   :  { %10 = sst [smem:[#allocation3]] %s2739_s4 }
   0x2 LB: > { %s1745_s21 = sadd.s32 4294967295, %s1811_s20   ;;  %p1749_p0 = scmp.ge.s32.totalorder %s1811_s20, 1  ;;  %s1811_s20 = sphi %s1855_s20, %s16_s20  }
   0x3   : > { %p188_p1 = scmp.lt.s32.totalorder %s1811_s20, 3 }
   0x5   : > { %p189_p2 = pnand %p1749_p0, %p188_p1 }
   0x6   : > { %p216_p3 = scmp.lt.s32.totalorder (!%p189_p2), %s1745_s21, 1  ;;  %s1813_s25 = smov (!%p189_p2), 1  }
   0x7   : > { %192 = sbr.rel (%p189_p2) target bundleno = 913 (0x391), region = 40  ;;  %s1814_s26 = smov (!%p189_p2), 15  }
   0x8   : > { %s1815_s27 = smov (!%p189_p2), 16   ;;  %s1816_s28 = smov (!%p189_p2), 17  }
   0x9   : > { %s1817_s29 = smov (!%p189_p2), 112   ;;  %s1818_s30 = smov (!%p189_p2), 113  }
   0xa   : > { %s1819_s6 = smov (!%p189_p2), 127   ;;  %s1820_s7 = smov (!%p189_p2), 111  }
   0xb   : > { %s226_s22 = sld [smem:[#allocation3]] (!%p189_p2) }
   0xc   : > { %s2742_s21 = smov (!%p216_p3, %s1745_s21), 1  ;;  %v251_v8 = vlaneseq  ;;  %v1756_v13 = vld [vmem:[%s2738_s3 + $0x3] ss:$8 sm:$0x3]  ;;  %v1821_v19 = vmov 0.0   ;;  %vm760_vm8 = vcmask 261120  }
   0xd   : > { %s1778_s4 = sshll.u32 %s2742_s21, 6  ;;  %v677_v14 = vld [vmem:[%s2736_s1 + $0x8] sm:$0xff]  ;;  %926 = vmatprep.mubr.f32.mxu1 %v1821_v19 }
   0xe   : > { %s1871_s24 = scalar_lea.vmem %s2735_s0, %s1778_s4  ;;  %v265_v9 = vshrl.u32 %v251_v8, 7  ;;  %v2013_v10 = vand.u32 127, %v251_v8  ;;  %837 = vmatprep.mubr.f32.mxu0 %v677_v14  ;;  %v1755_v36 = vld [vmem:[%s2738_s3 + $0x2] ss:$8 sm:$0x3]  ;;  %s2717_s19 = scalar_lea.vmem %s2740_s5, %s1778_s4 }
   0xf   : > { %v1874_v0 = vld [vmem:[%s1871_s24 + $0x30] sm:$0xff]  ;;  %v1877_v1 = vld [vmem:[%s1871_s24 + $0x20] sm:$0xff]  ;;  %v1884_v2 = vld [vmem:[%s1871_s24 + $0x38] sm:$0xff] }
  0x10   : > { %404 = vrot.lane.b32.xlu0 %v1874_v0, %s1813_s25  ;;  %402 = vrot.lane.b32.xlu1 %v1877_v1, %s1813_s25  ;;  %v1887_v3 = vld [vmem:[%s1871_s24 + $0x28] sm:$0xff]  ;;  %v1894_v4 = vld [vmem:[%s1871_s24 + $0x18] sm:$0xff]  ;;  %v2015_v11 = vsub.s32 0, %v265_v9  ;;  %v2017_v12 = vsub.s32 1, %v265_v9  ;;  %vm414_vm0 = vcmp.lt.s32.totalorder %v2013_v10, 1  ;;  %vm360_vm1 = vcmp.lt.s32.totalorder %v2013_v10, 15 }
  0x11   : > { %v1897_v5 = vld [vmem:[%s1871_s24 + $0x10] sm:$0xff]  ;;  %v1904_v6 = vld [vmem:[%s1871_s24 + $0x8] sm:$0xff]  ;;  %v1907_v7 = vld [vmem:[%s1871_s24] sm:$0xff]  ;;  %vm306_vm2 = vcmp.lt.s32.totalorder %v2013_v10, 16  ;;  %vm253_vm3 = vcmp.lt.s32.totalorder %v2013_v10, 17  ;;  %vm584_vm4 = vcmp.lt.s32.totalorder %v2013_v10, 112 }
  0x12   : > { %v433_v17 = vrot.slane %v1756_v13, %v2017_v12  ;;  %v429_v18 = vrot.slane %v1756_v13, %v2015_v11  ;;  %v379_v43 = vrot.slane %v1755_v36, %v2017_v12  ;;  %v375_v44 = vrot.slane %v1755_v36, %v2015_v11  ;;  %v1754_v63 = vld [vmem:[%s2738_s3 + $0x1] ss:$8 sm:$0x3] }
  0x13   : > { %vm530_vm5 = vcmp.lt.s32.totalorder %v2013_v10, 113  ;;  %vm476_vm6 = vcmp.lt.s32.totalorder %v2013_v10, 127  ;;  %vm638_vm7 = vcmp.lt.s32.totalorder %v2013_v10, 111  ;;  %v1406_v10 = vld [vmem:[%s2737_s2 + $0x30] sm:$0xff] }
  0x14   : > { %412 = vrot.lane.b32.xlu0 %v1884_v2, %s1813_s25  ;;  %410 = vrot.lane.b32.xlu1 %v1887_v3, %s1813_s25 }
  0x18   : > { %408 = vrot.lane.b32.xlu1 %v1894_v4, %s1813_s25  ;;  %400 = vrot.lane.b32.xlu0 %v1897_v5, %s1813_s25 }
  0x1c   : > { %406 = vrot.lane.b32.xlu1 %v1904_v6, %s1813_s25  ;;  %398 = vrot.lane.b32.xlu0 %v1907_v7, %s1813_s25 }
  0x20   : > { %358 = vrot.lane.b32.xlu1 %v1884_v2, %s1814_s26  ;;  %350 = vrot.lane.b32.xlu0 %v1874_v0, %s1814_s26 }
  0x24   : > { %356 = vrot.lane.b32.xlu1 %v1887_v3, %s1814_s26  ;;  %348 = vrot.lane.b32.xlu0 %v1877_v1, %s1814_s26 }
  0x28   : > { %354 = vrot.lane.b32.xlu1 %v1894_v4, %s1814_s26  ;;  %346 = vrot.lane.b32.xlu0 %v1897_v5, %s1814_s26 }
  0x2c   : > { %352 = vrot.lane.b32.xlu1 %v1904_v6, %s1814_s26  ;;  %344 = vrot.lane.b32.xlu0 %v1907_v7, %s1814_s26 }
  0x30   : > { %304 = vrot.lane.b32.xlu1 %v1884_v2, %s1815_s27  ;;  %296 = vrot.lane.b32.xlu0 %v1874_v0, %s1815_s27 }
  0x34   : > { %302 = vrot.lane.b32.xlu1 %v1887_v3, %s1815_s27  ;;  %294 = vrot.lane.b32.xlu0 %v1877_v1, %s1815_s27 }
  0x38   : > { %300 = vrot.lane.b32.xlu1 %v1894_v4, %s1815_s27  ;;  %292 = vrot.lane.b32.xlu0 %v1897_v5, %s1815_s27 }
  0x3c   : > { %298 = vrot.lane.b32.xlu1 %v1904_v6, %s1815_s27  ;;  %290 = vrot.lane.b32.xlu0 %v1907_v7, %s1815_s27 }
  0x40   : > { %249 = vrot.lane.b32.xlu1 %v1884_v2, %s1816_s28  ;;  %241 = vrot.lane.b32.xlu0 %v1874_v0, %s1816_s28 }
  0x44   : > { %247 = vrot.lane.b32.xlu1 %v1887_v3, %s1816_s28  ;;  %239 = vrot.lane.b32.xlu0 %v1877_v1, %s1816_s28 }
  0x48   : > { %245 = vrot.lane.b32.xlu1 %v1894_v4, %s1816_s28  ;;  %237 = vrot.lane.b32.xlu0 %v1897_v5, %s1816_s28 }
  0x4c   : > { %243 = vrot.lane.b32.xlu1 %v1904_v6, %s1816_s28  ;;  %235 = vrot.lane.b32.xlu0 %v1907_v7, %s1816_s28 }
  0x50   : > { %582 = vrot.lane.b32.xlu1 %v1884_v2, %s1817_s29  ;;  %574 = vrot.lane.b32.xlu0 %v1874_v0, %s1817_s29 }
  0x54   : > { %580 = vrot.lane.b32.xlu1 %v1887_v3, %s1817_s29  ;;  %572 = vrot.lane.b32.xlu0 %v1877_v1, %s1817_s29 }
  0x58   : > { %578 = vrot.lane.b32.xlu1 %v1894_v4, %s1817_s29  ;;  %570 = vrot.lane.b32.xlu0 %v1897_v5, %s1817_s29 }
  0x5c   : > { %576 = vrot.lane.b32.xlu1 %v1904_v6, %s1817_s29  ;;  %568 = vrot.lane.b32.xlu0 %v1907_v7, %s1817_s29 }
  0x60   : > { %528 = vrot.lane.b32.xlu1 %v1884_v2, %s1818_s30  ;;  %520 = vrot.lane.b32.xlu0 %v1874_v0, %s1818_s30 }
  0x64   : > { %526 = vrot.lane.b32.xlu1 %v1887_v3, %s1818_s30  ;;  %518 = vrot.lane.b32.xlu0 %v1877_v1, %s1818_s30 }
  0x68   : > { %524 = vrot.lane.b32.xlu1 %v1894_v4, %s1818_s30  ;;  %516 = vrot.lane.b32.xlu0 %v1897_v5, %s1818_s30 }
  0x6c   : > { %522 = vrot.lane.b32.xlu1 %v1904_v6, %s1818_s30  ;;  %514 = vrot.lane.b32.xlu0 %v1907_v7, %s1818_s30 }
  0x70   : > { %474 = vrot.lane.b32.xlu1 %v1884_v2, %s1819_s6  ;;  %466 = vrot.lane.b32.xlu0 %v1874_v0, %s1819_s6 }
  0x74   : > { %472 = vrot.lane.b32.xlu1 %v1887_v3, %s1819_s6  ;;  %464 = vrot.lane.b32.xlu0 %v1877_v1, %s1819_s6 }
  0x78   : > { %470 = vrot.lane.b32.xlu1 %v1894_v4, %s1819_s6  ;;  %462 = vrot.lane.b32.xlu0 %v1897_v5, %s1819_s6 }
  0x7c   : > { %468 = vrot.lane.b32.xlu1 %v1904_v6, %s1819_s6  ;;  %460 = vrot.lane.b32.xlu0 %v1907_v7, %s1819_s6 }
  0x80   : > { %636 = vrot.lane.b32.xlu1 %v1884_v2, %s1820_s7  ;;  %628 = vrot.lane.b32.xlu0 %v1874_v0, %s1820_s7 }
  0x82   : > { %v405_v15 = vpop.permute.xlu0 %404  ;;  %v403_v16 = vpop.permute.xlu1 %402 }
  0x84   : > { %634 = vrot.lane.b32.xlu1 %v1887_v3, %s1820_s7  ;;  %626 = vrot.lane.b32.xlu0 %v1877_v1, %s1820_s7 }
  0x86   : > { %v413_v20 = vpop.permute.xlu0 %412  ;;  %v411_v21 = vpop.permute.xlu1 %410 }
  0x87   : > { %v417_v22 = vsel %vm414_vm0, %v403_v16, %v411_v21  ;;  %v418_v23 = vsel %vm414_vm0, %v405_v15, %v413_v20  ;;  %v422_v24 = vsel %vm414_vm0, %v413_v20, %v405_v15  ;;  %v421_v25 = vsel %vm414_vm0, %v411_v21, %v403_v16 }
  0x88   : > { %632 = vrot.lane.b32.xlu1 %v1894_v4, %s1820_s7  ;;  %624 = vrot.lane.b32.xlu0 %v1897_v5, %s1820_s7  ;;  %v443_v26 = vmul.f32 %v433_v17, %v418_v23  ;;  %v442_v27 = vmul.f32 %v429_v18, %v422_v24  ;;  %v441_v30 = vmul.f32 %v433_v17, %v417_v22 }
  0x89   : > { %v440_v33 = vmul.f32 %v429_v18, %v421_v25 }
  0x8a   : > { %773 = vmatprep.subr.mxu0 %v443_v26  ;;  %v409_v28 = vpop.permute.xlu1 %408  ;;  %v401_v29 = vpop.permute.xlu0 %400 }
  0x8b   : > { %v416_v31 = vsel %vm414_vm0, %v401_v29, %v409_v28  ;;  %v420_v32 = vsel %vm414_vm0, %v409_v28, %v401_v29  ;;  %774 = vmatpush1.msra.mxu0 %v442_v27 }
  0x8c   : > { %775 = vmatprep.subr.mxu0 %v441_v30  ;;  %630 = vrot.lane.b32.xlu1 %v1904_v6, %s1820_s7  ;;  %v439_v34 = vmul.f32 %v433_v17, %v416_v31  ;;  %v438_v35 = vmul.f32 %v429_v18, %v420_v32 }
  0x8d   : > { %622 = vrot.lane.b32.xlu0 %v1907_v7, %s1820_s7  ;;  %776 = vmatpush1.msra.mxu0 %v440_v33 }
  0x8e   : > { %777 = vmatprep.subr.mxu0 %v439_v34  ;;  %v407_v37 = vpop.permute.xlu1 %406  ;;  %v399_v38 = vpop.permute.xlu0 %398 }
  0x8f   : > { %v415_v39 = vsel %vm414_vm0, %v399_v38, %v407_v37  ;;  %v419_v40 = vsel %vm414_vm0, %v407_v37, %v399_v38  ;;  %778 = vmatpush1.msra.mxu0 %v438_v35  ;;  %v262_v38 = vld [vmem:[%s2738_s3] ss:$8 sm:$0x3] }
  0x90   : > { %v437_v41 = vmul.f32 %v433_v17, %v415_v39  ;;  %v436_v42 = vmul.f32 %v429_v18, %v419_v40  ;;  %v325_v17 = vrot.slane %v1754_v63, %v2017_v12  ;;  %v321_v18 = vrot.slane %v1754_v63, %v2015_v11 }
  0x92   : > { %v359_v45 = vpop.permute.xlu1 %358  ;;  %779 = vmatprep.subr.mxu0 %v437_v41  ;;  %v351_v46 = vpop.permute.xlu0 %350 }
  0x93   : > { %v364_v47 = vsel %vm360_vm1, %v351_v46, %v359_v45  ;;  %v368_v48 = vsel %vm360_vm1, %v359_v45, %v351_v46  ;;  %780 = vmatpush1.msra.mxu0 %v436_v42  ;;  %v271_v45 = vrot.slane %v262_v38, %v2017_v12  ;;  %v267_v46 = vrot.slane %v262_v38, %v2015_v11 }
  0x94   : > { %v389_v49 = vmul.f32 %v379_v43, %v364_v47  ;;  %v388_v50 = vmul.f32 %v375_v44, %v368_v48 }
  0x96   : > { %v357_v51 = vpop.permute.xlu1 %356  ;;  %781 = vmatprep.subr.mxu0 %v389_v49  ;;  %v349_v52 = vpop.permute.xlu0 %348 }
  0x97   : > { %v363_v53 = vsel %vm360_vm1, %v349_v52, %v357_v51  ;;  %v367_v54 = vsel %vm360_vm1, %v357_v51, %v349_v52  ;;  %782 = vmatpush1.msra.mxu0 %v388_v50 }
  0x98   : > { %v387_v55 = vmul.f32 %v379_v43, %v363_v53  ;;  %v386_v56 = vmul.f32 %v375_v44, %v367_v54 }
  0x9a   : > { %v355_v57 = vpop.permute.xlu1 %354  ;;  %783 = vmatprep.subr.mxu0 %v387_v55  ;;  %v347_v58 = vpop.permute.xlu0 %346 }
  0x9b   : > { %v362_v59 = vsel %vm360_vm1, %v347_v58, %v355_v57  ;;  %v366_v60 = vsel %vm360_vm1, %v355_v57, %v347_v58  ;;  %784 = vmatpush1.msra.mxu0 %v386_v56 }
  0x9c   : > { %v385_v61 = vmul.f32 %v379_v43, %v362_v59  ;;  %v384_v62 = vmul.f32 %v375_v44, %v366_v60 }
  0x9e   : > { %v353_v8 = vpop.permute.xlu1 %352  ;;  %785 = vmatprep.subr.mxu0 %v385_v61  ;;  %v345_v9 = vpop.permute.xlu0 %344 }
  0x9f   : > { %v361_v13 = vsel %vm360_vm1, %v345_v9, %v353_v8  ;;  %v365_v14 = vsel %vm360_vm1, %v353_v8, %v345_v9  ;;  %786 = vmatpush1.msra.mxu0 %v384_v62  ;;  %v1759_v9 = vld [vmem:[%s2738_s3 + $0x7] ss:$8 sm:$0x3] }
  0xa0   : > { %v383_v15 = vmul.f32 %v379_v43, %v361_v13  ;;  %v382_v16 = vmul.f32 %v375_v44, %v365_v14 }
  0xa2   : > { %v305_v20 = vpop.permute.xlu1 %304  ;;  %787 = vmatprep.subr.mxu0 %v383_v15  ;;  %v297_v21 = vpop.permute.xlu0 %296 }
  0xa3   : > { %v310_v22 = vsel %vm306_vm2, %v297_v21, %v305_v20  ;;  %v314_v23 = vsel %vm306_vm2, %v305_v20, %v297_v21  ;;  %788 = vmatpush1.msra.mxu0 %v382_v16  ;;  %v599_v20 = vrot.slane %v1759_v9, %v2015_v11  ;;  %v603_v21 = vrot.slane %v1759_v9, %v2017_v12 }
  0xa4   : > { %v335_v24 = vmul.f32 %v325_v17, %v310_v22  ;;  %v334_v25 = vmul.f32 %v321_v18, %v314_v23 }
  0xa6   : > { %v303_v26 = vpop.permute.xlu1 %302  ;;  %789 = vmatprep.subr.mxu0 %v335_v24  ;;  %v295_v27 = vpop.permute.xlu0 %294 }
  0xa7   : > { %v309_v28 = vsel %vm306_vm2, %v295_v27, %v303_v26  ;;  %v313_v29 = vsel %vm306_vm2, %v303_v26, %v295_v27  ;;  %790 = vmatpush1.msra.mxu0 %v334_v25 }
  0xa8   : > { %v333_v30 = vmul.f32 %v325_v17, %v309_v28  ;;  %v332_v31 = vmul.f32 %v321_v18, %v313_v29 }
  0xaa   : > { %v301_v32 = vpop.permute.xlu1 %300  ;;  %791 = vmatprep.subr.mxu0 %v333_v30  ;;  %v293_v33 = vpop.permute.xlu0 %292 }
  0xab   : > { %v308_v34 = vsel %vm306_vm2, %v293_v33, %v301_v32  ;;  %v312_v35 = vsel %vm306_vm2, %v301_v32, %v293_v33  ;;  %792 = vmatpush1.msra.mxu0 %v332_v31 }
  0xac   : > { %v331_v36 = vmul.f32 %v325_v17, %v308_v34  ;;  %v330_v37 = vmul.f32 %v321_v18, %v312_v35 }
  0xae   : > { %v299_v39 = vpop.permute.xlu1 %298  ;;  %793 = vmatprep.subr.mxu0 %v331_v36  ;;  %v291_v40 = vpop.permute.xlu0 %290 }
  0xaf   : > { %v307_v41 = vsel %vm306_vm2, %v291_v40, %v299_v39  ;;  %v311_v42 = vsel %vm306_vm2, %v299_v39, %v291_v40  ;;  %794 = vmatpush1.msra.mxu0 %v330_v37  ;;  %v1758_v40 = vld [vmem:[%s2738_s3 + $0x6] ss:$8 sm:$0x3] }
  0xb0   : > { %v329_v43 = vmul.f32 %v325_v17, %v307_v41  ;;  %v328_v44 = vmul.f32 %v321_v18, %v311_v42 }
  0xb2   : > { %v250_v47 = vpop.permute.xlu1 %249  ;;  %795 = vmatprep.subr.mxu0 %v329_v43  ;;  %v242_v48 = vpop.permute.xlu0 %241 }
  0xb3   : > { %v257_v49 = vsel %vm253_vm3, %v242_v48, %v250_v47  ;;  %v261_v50 = vsel %vm253_vm3, %v250_v47, %v242_v48  ;;  %796 = vmatpush1.msra.mxu0 %v328_v44  ;;  %v545_v47 = vrot.slane %v1758_v40, %v2015_v11  ;;  %v549_v48 = vrot.slane %v1758_v40, %v2017_v12 }
  0xb4   : > { %v281_v51 = vmul.f32 %v271_v45, %v257_v49  ;;  %v280_v52 = vmul.f32 %v267_v46, %v261_v50 }
  0xb6   : > { %v248_v53 = vpop.permute.xlu1 %247  ;;  %797 = vmatprep.subr.mxu0 %v281_v51  ;;  %v240_v54 = vpop.permute.xlu0 %239 }
  0xb7   : > { %v256_v55 = vsel %vm253_vm3, %v240_v54, %v248_v53  ;;  %v260_v56 = vsel %vm253_vm3, %v248_v53, %v240_v54  ;;  %798 = vmatpush1.msra.mxu0 %v280_v52 }
  0xb8   : > { %v279_v57 = vmul.f32 %v271_v45, %v256_v55  ;;  %v278_v58 = vmul.f32 %v267_v46, %v260_v56 }
  0xba   : > { %v246_v59 = vpop.permute.xlu1 %245  ;;  %799 = vmatprep.subr.mxu0 %v279_v57  ;;  %v238_v60 = vpop.permute.xlu0 %237 }
  0xbb   : > { %v255_v61 = vsel %vm253_vm3, %v238_v60, %v246_v59  ;;  %v259_v62 = vsel %vm253_vm3, %v246_v59, %v238_v60  ;;  %800 = vmatpush1.msra.mxu0 %v278_v58 }
  0xbc   : > { %v277_v63 = vmul.f32 %v271_v45, %v255_v61  ;;  %v276_v8 = vmul.f32 %v267_v46, %v259_v62 }
  0xbe   : > { %v244_v13 = vpop.permute.xlu1 %243  ;;  %801 = vmatprep.subr.mxu0 %v277_v63  ;;  %v236_v14 = vpop.permute.xlu0 %235 }
  0xbf   : > { %v254_v15 = vsel %vm253_vm3, %v236_v14, %v244_v13  ;;  %v258_v16 = vsel %vm253_vm3, %v244_v13, %v236_v14  ;;  %802 = vmatpush1.msra.mxu0 %v276_v8  ;;  %v1757_v14 = vld [vmem:[%s2738_s3 + $0x5] ss:$8 sm:$0x3] }
  0xc0   : > { %v274_v17 = vmul.f32 %v267_v46, %v258_v16  ;;  %v275_v18 = vmul.f32 %v271_v45, %v254_v15 }
  0xc2   : > { %v583_v22 = vpop.permute.xlu1 %582  ;;  %803 = vmatprep.subr.mxu0 %v275_v18  ;;  %v575_v23 = vpop.permute.xlu0 %574 }
  0xc3   : > { %v588_v24 = vsel %vm584_vm4, %v575_v23, %v583_v22  ;;  %v592_v25 = vsel %vm584_vm4, %v583_v22, %v575_v23  ;;  %804 = vmatpush1.msra.mxu0 %v274_v17  ;;  %v491_v22 = vrot.slane %v1757_v14, %v2015_v11  ;;  %v495_v23 = vrot.slane %v1757_v14, %v2017_v12 }
  0xc4   : > { %v612_v26 = vmul.f32 %v599_v20, %v588_v24  ;;  %v613_v27 = vmul.f32 %v603_v21, %v592_v25 }
  0xc6   : > { %v581_v28 = vpop.permute.xlu1 %580  ;;  %805 = vmatprep.subr.mxu0 %v613_v27  ;;  %v573_v29 = vpop.permute.xlu0 %572 }
  0xc7   : > { %v587_v30 = vsel %vm584_vm4, %v573_v29, %v581_v28  ;;  %v591_v31 = vsel %vm584_vm4, %v581_v28, %v573_v29  ;;  %806 = vmatpush2.msra.mxu0 %v612_v26 }
  0xc8   : > { %v610_v32 = vmul.f32 %v599_v20, %v587_v30  ;;  %v611_v33 = vmul.f32 %v603_v21, %v591_v31 }
  0xca   : > { %v579_v34 = vpop.permute.xlu1 %578  ;;  %807 = vmatprep.subr.mxu0 %v611_v33  ;;  %v571_v35 = vpop.permute.xlu0 %570 }
  0xcb   : > { %v586_v36 = vsel %vm584_vm4, %v571_v35, %v579_v34  ;;  %v590_v37 = vsel %vm584_vm4, %v579_v34, %v571_v35  ;;  %808 = vmatpush2.msra.mxu0 %v610_v32 }
  0xcc   : > { %v608_v38 = vmul.f32 %v599_v20, %v586_v36  ;;  %v609_v39 = vmul.f32 %v603_v21, %v590_v37 }
  0xce   : > { %v577_v41 = vpop.permute.xlu1 %576  ;;  %809 = vmatprep.subr.mxu0 %v609_v39  ;;  %v569_v42 = vpop.permute.xlu0 %568 }
  0xcf   : > { %v585_v43 = vsel %vm584_vm4, %v569_v42, %v577_v41  ;;  %v589_v44 = vsel %vm584_vm4, %v577_v41, %v569_v42  ;;  %810 = vmatpush2.msra.mxu0 %v608_v38  ;;  %v1760_v42 = vld [vmem:[%s2738_s3 + $0x10] ss:$8 sm:$0x3] }
  0xd0   : > { %v606_v45 = vmul.f32 %v599_v20, %v585_v43  ;;  %v607_v46 = vmul.f32 %v603_v21, %v589_v44 }
  0xd2   : > { %v529_v49 = vpop.permute.xlu1 %528  ;;  %811 = vmatprep.subr.mxu0 %v607_v46  ;;  %v521_v50 = vpop.permute.xlu0 %520 }
  0xd3   : > { %v534_v51 = vsel %vm530_vm5, %v521_v50, %v529_v49  ;;  %v538_v52 = vsel %vm530_vm5, %v529_v49, %v521_v50  ;;  %812 = vmatpush2.msra.mxu0 %v606_v45  ;;  %v653_v49 = vrot.slane %v1760_v42, %v2015_v11  ;;  %v657_v50 = vrot.slane %v1760_v42, %v2017_v12 }
  0xd4   : > { %v558_v53 = vmul.f32 %v545_v47, %v534_v51  ;;  %v559_v54 = vmul.f32 %v549_v48, %v538_v52 }
  0xd6   : > { %v527_v55 = vpop.permute.xlu1 %526  ;;  %813 = vmatprep.subr.mxu0 %v559_v54  ;;  %v519_v56 = vpop.permute.xlu0 %518 }
  0xd7   : > { %v533_v57 = vsel %vm530_vm5, %v519_v56, %v527_v55  ;;  %v537_v58 = vsel %vm530_vm5, %v527_v55, %v519_v56  ;;  %814 = vmatpush2.msra.mxu0 %v558_v53 }
  0xd8   : > { %v556_v59 = vmul.f32 %v545_v47, %v533_v57  ;;  %v557_v60 = vmul.f32 %v549_v48, %v537_v58 }
  0xda   : > { %v525_v61 = vpop.permute.xlu1 %524  ;;  %815 = vmatprep.subr.mxu0 %v557_v60  ;;  %v517_v62 = vpop.permute.xlu0 %516 }
  0xdb   : > { %v532_v63 = vsel %vm530_vm5, %v517_v62, %v525_v61  ;;  %v536_v8 = vsel %vm530_vm5, %v525_v61, %v517_v62  ;;  %816 = vmatpush2.msra.mxu0 %v556_v59 }
  0xdc   : > { %v554_v9 = vmul.f32 %v545_v47, %v532_v63  ;;  %v555_v13 = vmul.f32 %v549_v48, %v536_v8  ;;  %v680_v63 = vld [vmem:[%s2736_s1 + $0x20] sm:$0xff] }
  0xde   : > { %v523_v15 = vpop.permute.xlu1 %522  ;;  %817 = vmatprep.subr.mxu0 %v555_v13  ;;  %v515_v16 = vpop.permute.xlu0 %514  ;;  %v683_v13 = vld [vmem:[%s2736_s1 + $0x38] sm:$0xff] }
  0xdf   : > { %v531_v17 = vsel %vm530_vm5, %v515_v16, %v523_v15  ;;  %v535_v18 = vsel %vm530_vm5, %v523_v15, %v515_v16  ;;  %818 = vmatpush2.msra.mxu0 %v554_v9 }
  0xe0   : > { %v552_v20 = vmul.f32 %v545_v47, %v531_v17  ;;  %v553_v21 = vmul.f32 %v549_v48, %v535_v18  ;;  %v682_v18 = vld [vmem:[%s2736_s1 + $0x30] sm:$0xff] }
  0xe2   : > { %v475_v24 = vpop.permute.xlu1 %474  ;;  %819 = vmatprep.subr.mxu0 %v553_v21  ;;  %v467_v25 = vpop.permute.xlu0 %466  ;;  %v686_v21 = vld [vmem:[%s2736_s1 + $0x50] sm:$0xff] }
  0xe3   : > { %v480_v26 = vsel %vm476_vm6, %v467_v25, %v475_v24  ;;  %v484_v27 = vsel %vm476_vm6, %v475_v24, %v467_v25  ;;  %820 = vmatpush2.msra.mxu0 %v552_v20  ;;  %v678_v20 = vld [vmem:[%s2736_s1 + $0x10] sm:$0xff]  ;;  %v684_v24 = vld [vmem:[%s2736_s1 + $0x40] sm:$0xff]  ;;  %v687_v25 = vld [vmem:[%s2736_s1 + $0x58] sm:$0xff] }
  0xe4   : > { %v504_v28 = vmul.f32 %v491_v22, %v480_v26  ;;  %v505_v29 = vmul.f32 %v495_v23, %v484_v27 }
  0xe6   : > { %v473_v30 = vpop.permute.xlu1 %472  ;;  %821 = vmatprep.subr.mxu0 %v505_v29  ;;  %v465_v31 = vpop.permute.xlu0 %464 }
  0xe7   : > { %v479_v32 = vsel %vm476_vm6, %v465_v31, %v473_v30  ;;  %v483_v33 = vsel %vm476_vm6, %v473_v30, %v465_v31  ;;  %822 = vmatpush2.msra.mxu0 %v504_v28  ;;  %v2260_v28 = vstv %s226_s22 }
  0xe8   : > { %v502_v34 = vmul.f32 %v491_v22, %v479_v32  ;;  %v503_v35 = vmul.f32 %v495_v23, %v483_v33 }
  0xea   : > { %v471_v36 = vpop.permute.xlu1 %470  ;;  %823 = vmatprep.subr.mxu0 %v503_v35  ;;  %v463_v37 = vpop.permute.xlu0 %462 }
  0xeb   : > { %v478_v38 = vsel %vm476_vm6, %v463_v37, %v471_v36  ;;  %v482_v39 = vsel %vm476_vm6, %v471_v36, %v463_v37  ;;  %824 = vmatpush2.msra.mxu0 %v502_v34 }
  0xec   : > { %v500_v40 = vmul.f32 %v491_v22, %v478_v38  ;;  %v501_v41 = vmul.f32 %v495_v23, %v482_v39 }
  0xee   : > { %v469_v43 = vpop.permute.xlu1 %468  ;;  %825 = vmatprep.subr.mxu0 %v501_v41  ;;  %v461_v44 = vpop.permute.xlu0 %460 }
  0xef   : > { %v477_v45 = vsel %vm476_vm6, %v461_v44, %v469_v43  ;;  %v481_v46 = vsel %vm476_vm6, %v469_v43, %v461_v44  ;;  %826 = vmatpush2.msra.mxu0 %v500_v40 }
  0xf0   : > { %v498_v47 = vmul.f32 %v491_v22, %v477_v45  ;;  %v499_v48 = vmul.f32 %v495_v23, %v481_v46  ;;  %v685_v22 = vld [vmem:[%s2736_s1 + $0x48] sm:$0xff] }
  0xf1   : > { %v681_v23 = vld [vmem:[%s2736_s1 + $0x28] sm:$0xff] }
  0xf2   : > { %v637_v51 = vpop.permute.xlu1 %636  ;;  %827 = vmatprep.subr.mxu0 %v499_v48  ;;  %v629_v52 = vpop.permute.xlu0 %628 }
  0xf3   : > { %v642_v53 = vsel %vm638_vm7, %v629_v52, %v637_v51  ;;  %828 = vmatpush2.msra.mxu0 %v498_v47  ;;  %v646_v54 = vsel %vm638_vm7, %v637_v51, %v629_v52 }
  0xf4   : > { %v667_v55 = vmul.f32 %v657_v50, %v646_v54  ;;  %v666_v56 = vmul.f32 %v653_v49, %v642_v53  ;;  %829 = vmatprep.subr.mxu0 %v1884_v2 }
  0xf5   : > { %830 = vmatpush2.msra.mxu0 %v1874_v0  ;;  %v676_v0 = vld [vmem:[%s2736_s1] sm:$0xff] }
  0xf6   : > { %v635_v57 = vpop.permute.xlu1 %634  ;;  %886 = vmatprep.subr.mxu1 %v667_v55  ;;  %v627_v58 = vpop.permute.xlu0 %626  ;;  %831 = vmatprep.subr.mxu0 %v1887_v3 }
  0xf7   : > { %v641_v59 = vsel %vm638_vm7, %v627_v58, %v635_v57  ;;  %v645_v60 = vsel %vm638_vm7, %v635_v57, %v627_v58  ;;  %887 = vmatpush1.msra.mxu1 %v666_v56  ;;  %832 = vmatpush2.msra.mxu0 %v1877_v1 }
  0xf8   : > { %v664_v61 = vmul.f32 %v653_v49, %v641_v59  ;;  %v665_v62 = vmul.f32 %v657_v50, %v645_v60  ;;  %833 = vmatprep.subr.mxu0 %v1894_v4 }
  0xf9   : > { %834 = vmatpush2.msra.mxu0 %v1897_v5 }
  0xfa   : > { %v633_v2 = vpop.permute.xlu1 %632  ;;  %888 = vmatprep.subr.mxu1 %v665_v62  ;;  %v625_v3 = vpop.permute.xlu0 %624  ;;  %835 = vmatprep.subr.mxu0 %v1904_v6  ;;  %v679_v6 = vld [vmem:[%s2736_s1 + $0x18] sm:$0xff] }
  0xfb   : > { %v640_v1 = vsel %vm638_vm7, %v625_v3, %v633_v2  ;;  %v644_v4 = vsel %vm638_vm7, %v633_v2, %v625_v3  ;;  %889 = vmatpush1.msra.mxu1 %v664_v61  ;;  %836 = vmatpush2.msra.mxu0 %v1907_v7 }
  0xfc   : > { %v662_v5 = vmul.f32 %v653_v49, %v640_v1  ;;  %v663_v8 = vmul.f32 %v657_v50, %v644_v4  ;;  %838 = vmatmul.mubr.f32.vlgmr.msra.gmra.mxu0 %v676_v0  ;;  %v1401_v1 = vld [vmem:[%s2737_s2 + $0x8] sm:$0xff] }
  0xfd   : > { %843 = vmatprep.mubr.f32.mxu0 %v680_v63 }
  0xfe   : > { %v631_v9 = vpop.permute.xlu1 %630  ;;  %890 = vmatprep.subr.mxu1 %v663_v8 }
  0xff   : > { %v623_v14 = vpop.permute.xlu0 %622  ;;  %891 = vmatpush1.msra.mxu1 %v662_v5 }
 0x100   : > { %v639_v15 = vsel %vm638_vm7, %v623_v14, %v631_v9  ;;  %v643_v7 = vsel %vm638_vm7, %v631_v9, %v623_v14  ;;  %844 = vmatmul.mubr.f32.gmra.mxu0 %v679_v6 }
 0x101   : > { %v660_v16 = vmul.f32 %v653_v49, %v639_v15  ;;  %v661_v17 = vmul.f32 %v657_v50, %v643_v7  ;;  %849 = vmatprep.mubr.f32.mxu0 %v683_v13 }
 0x103   : > { %892 = vmatprep.subr.mxu1 %v661_v17 }
 0x104   : > { %893 = vmatpush1.msra.mxu1 %v660_v16  ;;  %850 = vmatmul.mubr.f32.gmra.mxu0 %v682_v18 }
 0x105   : > { %1761 = vmatmul.mubr.msk.f32.vlgmr.msra.gmra.mxu1 %vm760_vm8, %v678_v20  ;;  %855 = vmatprep.mubr.f32.mxu0 %v686_v21 }
 0x106   : > { %932 = vmatprep.mubr.f32.mxu1 %v1821_v19 }
 0x108   : > { %856 = vmatmul.mubr.f32.gmra.mxu0 %v685_v22 }
 0x109   : > { %1762 = vmatmul.mubr.msk.f32.gmra.mxu1 %vm760_vm8, %v681_v23  ;;  %1657 = vmatprep.mubr.f32.mxu0 %v1821_v19 }
 0x10a   : > { %938 = vmatprep.mubr.f32.mxu1 %v1821_v19 }
 0x10d   : > { %1763 = vmatmul.mubr.msk.f32.gmra.mxu1 %vm760_vm8, %v684_v24 }
 0x10e   : > { %944 = vmatprep.mubr.f32.mxu1 %v1821_v19 }
 0x111   : > { %1764 = vmatmul.mubr.msk.f32.gmra.mxu1 %vm760_vm8, %v687_v25 }
 0x112   : > { %1568 = vmatprep.mubr.f32.mxu1 %v1401_v1 }
 0x1bc   : > { %v839_v26 = vpop.f32.mrf.mxu0 }
 0x1be   : > { %v841_v30 = vpop.f32.mrf.mxu0 }
 0x1c0   : > { %v845_v37 = vpop.f32.mrf.mxu0 }
 0x1c2   : > { %v847_v39 = vpop.f32.mrf.mxu0 }
 0x1c4   : > { %v851_v47 = vpop.f32.mrf.mxu0 }
 0x1c5   : > { %v928_v27 = vpop.f32.mrf.mxu1 }
 0x1c6   : > { %v929_v29 = vadd.f32 %v928_v27, %v839_v26  ;;  %v853_v49 = vpop.f32.mrf.mxu0 }
 0x1c7   : > { %v930_v31 = vpop.f32.mrf.mxu1 }
 0x1c8   : > { %vm951_vm9 = vcmp.ge.f32.partialorder %v929_v29, 0.0  ;;  %v960_v32 = vmul.f32 %v2260_v28, %v929_v29  ;;  %v931_v33 = vadd.f32 %v930_v31, %v841_v30  ;;  %v857_v57 = vpop.f32.mrf.mxu0 }
 0x1c9   : > { %v934_v38 = vpop.f32.mrf.mxu1 }
 0x1ca   : > { %v2263_v34 = vsel %vm951_vm9, %v929_v29, %v960_v32  ;;  %vm952_vm10 = vcmp.ge.f32.partialorder %v931_v33, 0.0  ;;  %v961_v35 = vmul.f32 %v2260_v28, %v931_v33  ;;  %v935_v41 = vadd.f32 %v934_v38, %v845_v37  ;;  %v859_v59 = vpop.f32.mrf.mxu0 }
 0x1cb   : > { %1132 = vrot.lane.b32.xlu0 %v2263_v34, %s1813_s25  ;;  %v936_v40 = vpop.f32.mrf.mxu1 }
 0x1cc   : > { %v2268_v36 = vsel %vm952_vm10, %v931_v33, %v961_v35  ;;  %v937_v42 = vadd.f32 %v936_v40, %v847_v39  ;;  %v962_v43 = vmul.f32 %v2260_v28, %v935_v41  ;;  %vm953_vm11 = vcmp.ge.f32.partialorder %v935_v41, 0.0  ;;  %v1767_v40 = vld [vmem:[%s2738_s3 + $0x3] ss:$8 sm:$0x3] }
 0x1cd   : > { %1140 = vrot.lane.b32.xlu1 %v2268_v36, %s1813_s25  ;;  %v940_v48 = vpop.f32.mrf.mxu1 }
 0x1ce   : > { %v963_v44 = vmul.f32 %v2260_v28, %v937_v42  ;;  %vm954_vm12 = vcmp.ge.f32.partialorder %v937_v42, 0.0  ;;  %v2286_v45 = vsel %vm953_vm11, %v935_v41, %v962_v43  ;;  %v941_v51 = vadd.f32 %v940_v48, %v851_v47 }
 0x1cf   : > { %1080 = vrot.lane.b32.xlu0 %v2263_v34, %s1814_s26  ;;  %v942_v50 = vpop.f32.mrf.mxu1  ;;  %v1165_v43 = vrot.slane %v1767_v40, %v2017_v12 }
 0x1d0   : > { %v2290_v46 = vsel %vm954_vm12, %v937_v42, %v963_v44  ;;  %v943_v52 = vadd.f32 %v942_v50, %v853_v49  ;;  %v964_v53 = vmul.f32 %v2260_v28, %v941_v51  ;;  %vm955_vm13 = vcmp.ge.f32.partialorder %v941_v51, 0.0 }
 0x1d1   : > { %1088 = vrot.lane.b32.xlu1 %v2268_v36, %s1814_s26  ;;  %v946_v58 = vpop.f32.mrf.mxu1  ;;  %v1161_v42 = vrot.slane %v1767_v40, %v2015_v11 }
 0x1d2   : > { %v965_v54 = vmul.f32 %v2260_v28, %v943_v52  ;;  %vm956_vm14 = vcmp.ge.f32.partialorder %v943_v52, 0.0  ;;  %v2308_v55 = vsel %vm955_vm13, %v941_v51, %v964_v53  ;;  %v947_v61 = vadd.f32 %v946_v58, %v857_v57 }
 0x1d3   : > { %1028 = vrot.lane.b32.xlu0 %v2263_v34, %s1815_s27  ;;  %v948_v60 = vpop.f32.mrf.mxu1 }
 0x1d4   : > { %v2312_v56 = vsel %vm956_vm14, %v943_v52, %v965_v54  ;;  %v949_v62 = vadd.f32 %v948_v60, %v859_v59  ;;  %v966_v0 = vmul.f32 %v2260_v28, %v947_v61  ;;  %vm957_vm15 = vcmp.ge.f32.partialorder %v947_v61, 0.0 }
 0x1d5   : > { %1036 = vrot.lane.b32.xlu1 %v2268_v36, %s1815_s27 }
 0x1d6   : > { %v967_v2 = vmul.f32 %v2260_v28, %v949_v62  ;;  %vm958_vm9 = vcmp.ge.f32.partialorder %v949_v62, 0.0  ;;  %v2334_v3 = vsel %vm957_vm15, %v947_v61, %v966_v0  ;;  %v1766_v61 = vld [vmem:[%s2738_s3 + $0x2] ss:$8 sm:$0x3] }
 0x1d7   : > { %976 = vrot.lane.b32.xlu0 %v2263_v34, %s1816_s28 }
 0x1d8   : > { %v2338_v63 = vsel %vm958_vm9, %v949_v62, %v967_v2 }
 0x1d9   : > { %984 = vrot.lane.b32.xlu1 %v2268_v36, %s1816_s28 }
 0x1db   : > { %1134 = vrot.lane.b32.xlu0 %v2286_v45, %s1813_s25 }
 0x1dd   : > { %1142 = vrot.lane.b32.xlu1 %v2290_v46, %s1813_s25 }
 0x1df   : > { %1082 = vrot.lane.b32.xlu0 %v2286_v45, %s1814_s26 }
 0x1e1   : > { %1090 = vrot.lane.b32.xlu1 %v2290_v46, %s1814_s26 }
 0x1e3   : > { %1030 = vrot.lane.b32.xlu0 %v2286_v45, %s1815_s27 }
 0x1e5   : > { %1038 = vrot.lane.b32.xlu1 %v2290_v46, %s1815_s27 }
 0x1e7   : > { %978 = vrot.lane.b32.xlu0 %v2286_v45, %s1816_s28 }
 0x1e9   : > { %986 = vrot.lane.b32.xlu1 %v2290_v46, %s1816_s28 }
 0x1eb   : > { %1136 = vrot.lane.b32.xlu0 %v2308_v55, %s1813_s25 }
 0x1ed   : > { %1144 = vrot.lane.b32.xlu1 %v2312_v56, %s1813_s25 }
 0x1ef   : > { %1084 = vrot.lane.b32.xlu0 %v2308_v55, %s1814_s26 }
 0x1f1   : > { %1092 = vrot.lane.b32.xlu1 %v2312_v56, %s1814_s26 }
 0x1f3   : > { %1032 = vrot.lane.b32.xlu0 %v2308_v55, %s1815_s27 }
 0x1f5   : > { %1040 = vrot.lane.b32.xlu1 %v2312_v56, %s1815_s27 }
 0x1f7   : > { %980 = vrot.lane.b32.xlu0 %v2308_v55, %s1816_s28 }
 0x1f9   : > { %988 = vrot.lane.b32.xlu1 %v2312_v56, %s1816_s28 }
 0x1fb   : > { %1300 = vrot.lane.b32.xlu0 %v2308_v55, %s1817_s29 }
 0x1fd   : > { %1308 = vrot.lane.b32.xlu1 %v2312_v56, %s1817_s29 }
 0x1ff   : > { %1138 = vrot.lane.b32.xlu0 %v2334_v3, %s1813_s25 }
 0x201   : > { %1146 = vrot.lane.b32.xlu1 %v2338_v63, %s1813_s25 }
 0x203   : > { %1298 = vrot.lane.b32.xlu0 %v2286_v45, %s1817_s29 }
 0x205   : > { %1306 = vrot.lane.b32.xlu1 %v2290_v46, %s1817_s29 }
 0x207   : > { %1086 = vrot.lane.b32.xlu0 %v2334_v3, %s1814_s26 }
 0x209   : > { %1094 = vrot.lane.b32.xlu1 %v2338_v63, %s1814_s26 }
 0x20b   : > { %1034 = vrot.lane.b32.xlu0 %v2334_v3, %s1815_s27 }
 0x20d   : > { %1304 = vrot.lane.b32.xlu1 %v2268_v36, %s1817_s29 }
 0x20f   : > { %982 = vrot.lane.b32.xlu0 %v2334_v3, %s1816_s28 }
 0x211   : > { %1042 = vrot.lane.b32.xlu1 %v2338_v63, %s1815_s27 }
 0x213   : > { %1302 = vrot.lane.b32.xlu0 %v2334_v3, %s1817_s29 }
 0x215   : > { %1256 = vrot.lane.b32.xlu1 %v2312_v56, %s1818_s30 }
 0x217   : > { %1296 = vrot.lane.b32.xlu0 %v2263_v34, %s1817_s29 }
 0x219   : > { %990 = vrot.lane.b32.xlu1 %v2338_v63, %s1816_s28 }
 0x21b   : > { %1250 = vrot.lane.b32.xlu0 %v2334_v3, %s1818_s30 }
 0x21d   : > { %1254 = vrot.lane.b32.xlu1 %v2290_v46, %s1818_s30 }
 0x21f   : > { %1248 = vrot.lane.b32.xlu0 %v2308_v55, %s1818_s30 }
 0x221   : > { %1310 = vrot.lane.b32.xlu1 %v2338_v63, %s1817_s29 }
 0x223   : > { %1246 = vrot.lane.b32.xlu0 %v2286_v45, %s1818_s30 }
 0x225   : > { %1252 = vrot.lane.b32.xlu1 %v2268_v36, %s1818_s30 }
 0x227   : > { %1244 = vrot.lane.b32.xlu0 %v2263_v34, %s1818_s30 }
 0x229   : > { %1258 = vrot.lane.b32.xlu1 %v2338_v63, %s1818_s30 }
 0x22b   : > { %1198 = vrot.lane.b32.xlu0 %v2334_v3, %s1819_s6 }
 0x22d   : > { %1204 = vrot.lane.b32.xlu1 %v2312_v56, %s1819_s6 }
 0x22f   : > { %1196 = vrot.lane.b32.xlu0 %v2308_v55, %s1819_s6 }
 0x231   : > { %1206 = vrot.lane.b32.xlu1 %v2338_v63, %s1819_s6 }
 0x233   : > { %1194 = vrot.lane.b32.xlu0 %v2286_v45, %s1819_s6 }
 0x235   : > { %1202 = vrot.lane.b32.xlu1 %v2290_v46, %s1819_s6 }
 0x237   : > { %1192 = vrot.lane.b32.xlu0 %v2263_v34, %s1819_s6 }
 0x239   : > { %1200 = vrot.lane.b32.xlu1 %v2268_v36, %s1819_s6 }
 0x23b   : > { %1354 = vrot.lane.b32.xlu0 %v2334_v3, %s1820_s7 }
 0x23d   : > { %1360 = vrot.lane.b32.xlu1 %v2312_v56, %s1820_s7  ;;  %v1133_v4 = vpop.permute.xlu0 %1132 }
 0x23f   : > { %v1141_v5 = vpop.permute.xlu1 %1140  ;;  %1352 = vrot.lane.b32.xlu0 %v2308_v55, %s1820_s7 }
 0x240   : > { %v1148_v60 = vsel %vm414_vm0, %v1133_v4, %v1141_v5  ;;  %v1152_v0 = vsel %vm414_vm0, %v1141_v5, %v1133_v4 }
 0x241   : > { %1362 = vrot.lane.b32.xlu1 %v2338_v63, %s1820_s7  ;;  %v2409_v8 = vpop.permute.xlu0 %1080 }
 0x243   : > { %v2411_v6 = vpop.permute.xlu1 %1088  ;;  %1350 = vrot.lane.b32.xlu0 %v2286_v45, %s1820_s7 }
 0x245   : > { %1358 = vrot.lane.b32.xlu1 %v2290_v46, %s1820_s7  ;;  %v1029_v9 = vpop.permute.xlu0 %1028 }
 0x247   : > { %v1037_v13 = vpop.permute.xlu1 %1036  ;;  %1348 = vrot.lane.b32.xlu0 %v2263_v34, %s1820_s7 }
 0x248   : > { %v2421_v14 = vsel %vm306_vm2, %v1029_v9, %v1037_v13  ;;  %v2425_v15 = vsel %vm306_vm2, %v1037_v13, %v1029_v9  ;;  %v1169_v13 = vmul.f32 %v1165_v43, %v1148_v60 }
 0x249   : > { %1356 = vrot.lane.b32.xlu1 %v2268_v36, %s1820_s7  ;;  %v977_v7 = vpop.permute.xlu0 %976 }
 0x24b   : > { %v985_v16 = vpop.permute.xlu1 %984 }
 0x24c   : > { %v2431_v17 = vsel %vm253_vm3, %v977_v7, %v985_v16  ;;  %v2435_v18 = vsel %vm253_vm3, %v985_v16, %v977_v7  ;;  %v1109_v7 = vrot.slane %v1766_v61, %v2015_v11  ;;  %v1113_v16 = vrot.slane %v1766_v61, %v2017_v12 }
 0x24d   : > { %v1135_v20 = vpop.permute.xlu0 %1134 }
 0x24f   : > { %v1143_v21 = vpop.permute.xlu1 %1142 }
 0x250   : > { %v1149_v54 = vsel %vm414_vm0, %v1135_v20, %v1143_v21  ;;  %v1153_v57 = vsel %vm414_vm0, %v1143_v21, %v1135_v20  ;;  %v1168_v21 = vmul.f32 %v1161_v42, %v1152_v0 }
 0x251   : > { %v1083_v22 = vpop.permute.xlu0 %1082  ;;  %v1171_v2 = vmul.f32 %v1165_v43, %v1149_v54  ;;  %v1170_v9 = vmul.f32 %v1161_v42, %v1153_v57 }
 0x253   : > { %v1091_v23 = vpop.permute.xlu1 %1090 }
 0x255   : > { %v2437_v24 = vpop.permute.xlu0 %1030 }
 0x257   : > { %v2439_v25 = vpop.permute.xlu1 %1038 }
 0x259   : > { %v2441_v26 = vpop.permute.xlu0 %978 }
 0x25b   : > { %v2443_v27 = vpop.permute.xlu1 %986 }
 0x25d   : > { %v1137_v28 = vpop.permute.xlu0 %1136 }
 0x25f   : > { %v1145_v29 = vpop.permute.xlu1 %1144 }
 0x260   : > { %v1150_v47 = vsel %vm414_vm0, %v1137_v28, %v1145_v29  ;;  %v1154_v50 = vsel %vm414_vm0, %v1145_v29, %v1137_v28 }
 0x261   : > { %v1085_v30 = vpop.permute.xlu0 %1084  ;;  %v1173_v58 = vmul.f32 %v1165_v43, %v1150_v47  ;;  %v1172_v62 = vmul.f32 %v1161_v42, %v1154_v50 }
 0x263   : > { %v1093_v31 = vpop.permute.xlu1 %1092 }
 0x264   : > { %v1098_v28 = vsel %vm360_vm1, %v1085_v30, %v1093_v31  ;;  %v1102_v5 = vsel %vm360_vm1, %v1093_v31, %v1085_v30  ;;  %v1096_v30 = vsel %vm360_vm1, %v2409_v8, %v2411_v6  ;;  %v1765_v31 = vld [vmem:[%s2738_s3 + $0x1] ss:$8 sm:$0x3] }
 0x265   : > { %v2445_v32 = vpop.permute.xlu0 %1032  ;;  %v1121_v47 = vmul.f32 %v1113_v16, %v1098_v28  ;;  %v1057_v54 = vrot.slane %v1765_v31, %v2015_v11  ;;  %v1061_v57 = vrot.slane %v1765_v31, %v2017_v12 }
 0x267   : > { %v2447_v33 = vpop.permute.xlu1 %1040 }
 0x268   : > { %v1046_v61 = vsel %vm306_vm2, %v2445_v32, %v2447_v33 }
 0x269   : > { %v2449_v35 = vpop.permute.xlu0 %980 }
 0x26b   : > { %v2451_v37 = vpop.permute.xlu1 %988 }
 0x26d   : > { %v2453_v38 = vpop.permute.xlu0 %1300 }
 0x26f   : > { %v2455_v39 = vpop.permute.xlu1 %1308 }
 0x271   : > { %v1139_v41 = vpop.permute.xlu0 %1138 }
 0x273   : > { %v1147_v44 = vpop.permute.xlu1 %1146 }
 0x274   : > { %v1151_v48 = vsel %vm414_vm0, %v1139_v41, %v1147_v44  ;;  %v1155_v49 = vsel %vm414_vm0, %v1147_v44, %v1139_v41  ;;  %v1101_v44 = vsel %vm360_vm1, %v1091_v23, %v1083_v22 }
 0x275   : > { %v1174_v51 = vmul.f32 %v1161_v42, %v1155_v49  ;;  %v1175_v52 = vmul.f32 %v1165_v43, %v1151_v48  ;;  %v2470_v53 = vpop.permute.xlu0 %1298  ;;  %v1097_v42 = vsel %vm360_vm1, %v1083_v22, %v1091_v23  ;;  %v1120_v49 = vmul.f32 %v1109_v7, %v1102_v5 }
 0x276   : > { %v1100_v22 = vsel %vm360_vm1, %v2411_v6, %v2409_v8  ;;  %v1119_v23 = vmul.f32 %v1113_v16, %v1097_v42  ;;  %v1064_v5 = vmul.f32 %v1057_v54, %v2425_v15 }
 0x277   : > { %v2476_v59 = vpop.permute.xlu1 %1306  ;;  %1504 = vmatprep.subr.mxu1 %v1175_v52  ;;  %v1117_v52 = vmul.f32 %v1113_v16, %v1096_v30  ;;  %v1116_v60 = vmul.f32 %v1109_v7, %v1100_v22  ;;  %v997_v30 = vsel %vm253_vm3, %v2443_v27, %v2441_v26 }
 0x278   : > { %1505 = vmatpush1.msra.mxu1 %v1174_v51  ;;  %v1118_v51 = vmul.f32 %v1109_v7, %v1101_v44 }
 0x279   : > { %1506 = vmatprep.subr.mxu1 %v1173_v58  ;;  %v1087_v1 = vpop.permute.xlu0 %1086 }
 0x27a   : > { %1507 = vmatpush1.msra.mxu1 %v1172_v62  ;;  %v1050_v62 = vsel %vm306_vm2, %v2447_v33, %v2445_v32  ;;  %v1000_v32 = vld [vmem:[%s2738_s3] ss:$8 sm:$0x3] }
 0x27b   : > { %v1095_v20 = vpop.permute.xlu1 %1094  ;;  %1508 = vmatprep.subr.mxu1 %v1171_v2  ;;  %v1068_v33 = vmul.f32 %v1057_v54, %v1050_v62 }
 0x27c   : > { %v1099_v29 = vsel %vm360_vm1, %v1087_v1, %v1095_v20  ;;  %v1103_v4 = vsel %vm360_vm1, %v1095_v20, %v1087_v1  ;;  %1509 = vmatpush1.msra.mxu1 %v1170_v9  ;;  %v1045_v9 = vsel %vm306_vm2, %v2437_v24, %v2439_v25 }
 0x27d   : > { %v1122_v40 = vmul.f32 %v1109_v7, %v1103_v4  ;;  %v1123_v41 = vmul.f32 %v1113_v16, %v1099_v29  ;;  %1510 = vmatprep.subr.mxu1 %v1169_v13  ;;  %v1035_v43 = vpop.permute.xlu0 %1034  ;;  %v1049_v13 = vsel %vm306_vm2, %v2439_v25, %v2437_v24  ;;  %v1069_v7 = vmul.f32 %v1061_v57, %v1046_v61 }
 0x27e   : > { %1511 = vmatpush1.msra.mxu1 %v1168_v21  ;;  %v1067_v20 = vmul.f32 %v1061_v57, %v1045_v9  ;;  %v1066_v28 = vmul.f32 %v1057_v54, %v1049_v13  ;;  %v1065_v29 = vmul.f32 %v1061_v57, %v2421_v14  ;;  %v1005_v4 = vrot.slane %v1000_v32, %v2015_v11 }
 0x27f   : > { %v2499_v48 = vpop.permute.xlu1 %1304  ;;  %1512 = vmatprep.subr.mxu1 %v1123_v41  ;;  %v1009_v24 = vrot.slane %v1000_v32, %v2017_v12  ;;  %v998_v14 = vsel %vm253_vm3, %v2451_v37, %v2449_v35 }
 0x280   : > { %1513 = vmatpush1.msra.mxu1 %v1122_v40  ;;  %v994_v40 = vsel %vm253_vm3, %v2449_v35, %v2451_v37  ;;  %v1016_v22 = vmul.f32 %v1005_v4, %v998_v14  ;;  %v1770_v35 = vld [vmem:[%s2738_s3 + $0x7] ss:$8 sm:$0x3] }
 0x281   : > { %1514 = vmatprep.subr.mxu1 %v1121_v47  ;;  %v983_v50 = vpop.permute.xlu0 %982  ;;  %v993_v47 = vsel %vm253_vm3, %v2441_v26, %v2443_v27  ;;  %v1017_v31 = vmul.f32 %v1009_v24, %v994_v40  ;;  %v1329_v26 = vrot.slane %v1770_v35, %v2017_v12 }
 0x282   : > { %1515 = vmatpush1.msra.mxu1 %v1120_v49  ;;  %v1015_v37 = vmul.f32 %v1009_v24, %v993_v47 }
 0x283   : > { %v1043_v58 = vpop.permute.xlu1 %1042  ;;  %1516 = vmatprep.subr.mxu1 %v1119_v23 }
 0x284   : > { %v1047_v8 = vsel %vm306_vm2, %v1035_v43, %v1043_v58  ;;  %v1051_v6 = vsel %vm306_vm2, %v1043_v58, %v1035_v43  ;;  %1517 = vmatpush1.msra.mxu1 %v1118_v51  ;;  %v1013_v51 = vmul.f32 %v1009_v24, %v2431_v17  ;;  %v1314_v17 = vsel %vm584_vm4, %v2453_v38, %v2455_v39 }
 0x285   : > { %v1070_v0 = vmul.f32 %v1057_v54, %v1051_v6  ;;  %v1071_v2 = vmul.f32 %v1061_v57, %v1047_v8  ;;  %1518 = vmatprep.subr.mxu1 %v1117_v52  ;;  %v1303_v1 = vpop.permute.xlu0 %1302  ;;  %v1325_v52 = vrot.slane %v1770_v35, %v2015_v11  ;;  %v1012_v54 = vmul.f32 %v1005_v4, %v2435_v18 }
 0x286   : > { %1519 = vmatpush1.msra.mxu1 %v1116_v60  ;;  %v1318_v57 = vsel %vm584_vm4, %v2455_v39, %v2453_v38  ;;  %v1317_v6 = vsel %vm584_vm4, %v2476_v59, %v2470_v53  ;;  %v1769_v39 = vld [vmem:[%s2738_s3 + $0x6] ss:$8 sm:$0x3] }
 0x287   : > { %v2534_v16 = vpop.permute.xlu1 %1256  ;;  %1520 = vmatprep.subr.mxu1 %v1071_v2  ;;  %v1337_v62 = vmul.f32 %v1329_v26, %v1318_v57  ;;  %v1335_v9 = vmul.f32 %v1329_v26, %v1317_v6  ;;  %v1273_v32 = vrot.slane %v1769_v39, %v2015_v11 }
 0x288   : > { %1521 = vmatpush1.msra.mxu1 %v1070_v0  ;;  %v1313_v0 = vsel %vm584_vm4, %v2470_v53, %v2476_v59 }
 0x289   : > { %1522 = vmatprep.subr.mxu1 %v1069_v7  ;;  %v1297_v21 = vpop.permute.xlu0 %1296  ;;  %v1334_v53 = vmul.f32 %v1325_v52, %v1313_v0 }
 0x28a   : > { %1523 = vmatpush1.msra.mxu1 %v1068_v33  ;;  %v1316_v38 = vsel %vm584_vm4, %v2499_v48, %v1297_v21  ;;  %v1312_v13 = vsel %vm584_vm4, %v1297_v21, %v2499_v48  ;;  %v1277_v33 = vrot.slane %v1769_v39, %v2017_v12 }
 0x28b   : > { %v991_v25 = vpop.permute.xlu1 %990  ;;  %1524 = vmatprep.subr.mxu1 %v1067_v20  ;;  %v1333_v59 = vmul.f32 %v1329_v26, %v1316_v38 }
 0x28c   : > { %v995_v41 = vsel %vm253_vm3, %v983_v50, %v991_v25  ;;  %v999_v43 = vsel %vm253_vm3, %v991_v25, %v983_v50  ;;  %1525 = vmatpush1.msra.mxu1 %v1066_v28  ;;  %v1014_v50 = vmul.f32 %v1005_v4, %v997_v30  ;;  %v1332_v28 = vmul.f32 %v1325_v52, %v1312_v13 }
 0x28d   : > { %v1018_v42 = vmul.f32 %v1005_v4, %v999_v43  ;;  %v1019_v44 = vmul.f32 %v1009_v24, %v995_v41  ;;  %1526 = vmatprep.subr.mxu1 %v1065_v29  ;;  %v1251_v15 = vpop.permute.xlu0 %1250 }
 0x28e   : > { %1527 = vmatpush1.msra.mxu1 %v1064_v5 }
 0x28f   : > { %v1255_v49 = vpop.permute.xlu1 %1254  ;;  %1528 = vmatprep.subr.mxu1 %v1019_v44 }
 0x290   : > { %1529 = vmatpush1.msra.mxu1 %v1018_v42 }
 0x291   : > { %1530 = vmatprep.subr.mxu1 %v1017_v31  ;;  %v1249_v23 = vpop.permute.xlu0 %1248 }
 0x292   : > { %1531 = vmatpush1.msra.mxu1 %v1016_v22  ;;  %v1266_v29 = vsel %vm530_vm5, %v2534_v16, %v1249_v23  ;;  %v1262_v21 = vsel %vm530_vm5, %v1249_v23, %v2534_v16  ;;  %v1768_v16 = vld [vmem:[%s2738_s3 + $0x5] ss:$8 sm:$0x3] }
 0x293   : > { %v1311_v27 = vpop.permute.xlu1 %1310  ;;  %1532 = vmatprep.subr.mxu1 %v1015_v37  ;;  %v1285_v41 = vmul.f32 %v1277_v33, %v1266_v29  ;;  %v1284_v42 = vmul.f32 %v1273_v32, %v1262_v21  ;;  %v1221_v22 = vrot.slane %v1768_v16, %v2015_v11  ;;  %v1225_v35 = vrot.slane %v1768_v16, %v2017_v12  ;;  %v1410_v16 = vld [vmem:[%s2737_s2 + $0x50] sm:$0xff] }
 0x294   : > { %v1315_v58 = vsel %vm584_vm4, %v1303_v1, %v1311_v27  ;;  %v1319_v60 = vsel %vm584_vm4, %v1311_v27, %v1303_v1  ;;  %1533 = vmatpush1.msra.mxu1 %v1014_v50  ;;  %v1336_v1 = vmul.f32 %v1325_v52, %v1314_v17 }
 0x295   : > { %v1338_v61 = vmul.f32 %v1325_v52, %v1315_v58  ;;  %v1339_v8 = vmul.f32 %v1329_v26, %v1319_v60  ;;  %1534 = vmatprep.subr.mxu1 %v1013_v51  ;;  %v1247_v18 = vpop.permute.xlu0 %1246 }
 0x296   : > { %1535 = vmatpush1.msra.mxu1 %v1012_v54  ;;  %v1265_v40 = vsel %vm530_vm5, %v1255_v49, %v1247_v18  ;;  %v1261_v43 = vsel %vm530_vm5, %v1247_v18, %v1255_v49 }
 0x297   : > { %v1253_v2 = vpop.permute.xlu1 %1252  ;;  %1536 = vmatprep.subr.mxu1 %v1339_v8  ;;  %v1282_v31 = vmul.f32 %v1273_v32, %v1261_v43 }
 0x298   : > { %1537 = vmatpush2.msra.mxu1 %v1338_v61 }
 0x299   : > { %1538 = vmatprep.subr.mxu1 %v1337_v62  ;;  %v1245_v7 = vpop.permute.xlu0 %1244 }
 0x29a   : > { %1539 = vmatpush2.msra.mxu1 %v1336_v1  ;;  %v1264_v44 = vsel %vm530_vm5, %v1253_v2, %v1245_v7  ;;  %v1260_v47 = vsel %vm530_vm5, %v1245_v7, %v1253_v2  ;;  %v1771_v7 = vld [vmem:[%s2738_s3 + $0x10] ss:$8 sm:$0x3] }
 0x29b   : > { %v1259_v20 = vpop.permute.xlu1 %1258  ;;  %1540 = vmatprep.subr.mxu1 %v1335_v9  ;;  %v1281_v49 = vmul.f32 %v1277_v33, %v1264_v44  ;;  %v1280_v23 = vmul.f32 %v1273_v32, %v1260_v47  ;;  %v1407_v44 = vld [vmem:[%s2737_s2 + $0x38] sm:$0xff]  ;;  %v1409_v47 = vld [vmem:[%s2737_s2 + $0x48] sm:$0xff] }
 0x29c   : > { %v1263_v4 = vsel %vm530_vm5, %v1251_v15, %v1259_v20  ;;  %v1267_v48 = vsel %vm530_vm5, %v1259_v20, %v1251_v15  ;;  %1541 = vmatpush2.msra.mxu1 %v1334_v53  ;;  %v1283_v15 = vmul.f32 %v1277_v33, %v1265_v40  ;;  %v1403_v40 = vld [vmem:[%s2737_s2 + $0x18] sm:$0xff] }
 0x29d   : > { %v1286_v24 = vmul.f32 %v1273_v32, %v1263_v4  ;;  %v1287_v25 = vmul.f32 %v1277_v33, %v1267_v48  ;;  %1542 = vmatprep.subr.mxu1 %v1333_v59  ;;  %v1199_v5 = vpop.permute.xlu0 %1198  ;;  %v1377_v59 = vrot.slane %v1771_v7, %v2015_v11  ;;  %v1381_v32 = vrot.slane %v1771_v7, %v2017_v12  ;;  %v1400_v48 = vld [vmem:[%s2737_s2] sm:$0xff]  ;;  %v1491_v7 = vld [vmem:[%s1871_s24 + $0x38] sm:$0xff] }
 0x29e   : > { %1543 = vmatpush2.msra.mxu1 %v1332_v28 }
 0x29f   : > { %v1205_v14 = vpop.permute.xlu1 %1204  ;;  %1544 = vmatprep.subr.mxu1 %v1287_v25 }
 0x2a0   : > { %1545 = vmatpush2.msra.mxu1 %v1286_v24 }
 0x2a1   : > { %1546 = vmatprep.subr.mxu1 %v1285_v41  ;;  %v1197_v30 = vpop.permute.xlu0 %1196 }
 0x2a2   : > { %1547 = vmatpush2.msra.mxu1 %v1284_v42  ;;  %v1214_v50 = vsel %vm476_vm6, %v1205_v14, %v1197_v30  ;;  %v1210_v26 = vsel %vm476_vm6, %v1197_v30, %v1205_v14  ;;  %v1402_v42 = vld [vmem:[%s2737_s2 + $0x10] sm:$0xff]  ;;  %v1408_v30 = vld [vmem:[%s2737_s2 + $0x40] sm:$0xff] }
 0x2a3   : > { %v1207_v37 = vpop.permute.xlu1 %1206  ;;  %1548 = vmatprep.subr.mxu1 %v1283_v15  ;;  %v1233_v58 = vmul.f32 %v1225_v35, %v1214_v50  ;;  %v1232_v17 = vmul.f32 %v1221_v22, %v1210_v26  ;;  %v1405_v15 = vld [vmem:[%s2737_s2 + $0x28] sm:$0xff] }
 0x2a4   : > { %v1211_v51 = vsel %vm476_vm6, %v1199_v5, %v1207_v37  ;;  %v1215_v52 = vsel %vm476_vm6, %v1207_v37, %v1199_v5  ;;  %1549 = vmatpush2.msra.mxu1 %v1282_v31  ;;  %v1411_v31 = vld [vmem:[%s2737_s2 + $0x58] sm:$0xff] }
 0x2a5   : > { %v1234_v27 = vmul.f32 %v1221_v22, %v1211_v51  ;;  %v1235_v54 = vmul.f32 %v1225_v35, %v1215_v52  ;;  %1550 = vmatprep.subr.mxu1 %v1281_v49  ;;  %v1195_v57 = vpop.permute.xlu0 %1194  ;;  %v1486_v52 = vld [vmem:[%s1871_s24 + $0x10] sm:$0xff] }
 0x2a6   : > { %1551 = vmatpush2.msra.mxu1 %v1280_v23  ;;  %v1485_v23 = vld [vmem:[%s1871_s24 + $0x8] sm:$0xff] }
 0x2a7   : > { %v1203_v60 = vpop.permute.xlu1 %1202  ;;  %1552 = vmatprep.subr.mxu1 %v1235_v54  ;;  %v1487_v54 = vld [vmem:[%s1871_s24 + $0x18] sm:$0xff] }
 0x2a8   : > { %v1209_v61 = vsel %vm476_vm6, %v1195_v57, %v1203_v60  ;;  %v1213_v8 = vsel %vm476_vm6, %v1203_v60, %v1195_v57  ;;  %1553 = vmatpush2.msra.mxu1 %v1234_v27 }
 0x2a9   : > { %v1230_v18 = vmul.f32 %v1221_v22, %v1209_v61  ;;  %v1231_v6 = vmul.f32 %v1225_v35, %v1213_v8  ;;  %1554 = vmatprep.subr.mxu1 %v1233_v58  ;;  %v1193_v62 = vpop.permute.xlu0 %1192  ;;  %v1488_v61 = vld [vmem:[%s1871_s24 + $0x20] sm:$0xff] }
 0x2aa   : > { %1555 = vmatpush2.msra.mxu1 %v1232_v17 }
 0x2ab   : > { %v1201_v0 = vpop.permute.xlu1 %1200  ;;  %1556 = vmatprep.subr.mxu1 %v1231_v6 }
 0x2ac   : > { %v1208_v2 = vsel %vm476_vm6, %v1193_v62, %v1201_v0  ;;  %v1212_v1 = vsel %vm476_vm6, %v1201_v0, %v1193_v62  ;;  %1557 = vmatpush2.msra.mxu1 %v1230_v18  ;;  %v1489_v0 = vld [vmem:[%s1871_s24 + $0x28] sm:$0xff] }
 0x2ad   : > { %v1228_v38 = vmul.f32 %v1221_v22, %v1208_v2  ;;  %v1229_v39 = vmul.f32 %v1225_v35, %v1212_v1  ;;  %v1355_v9 = vpop.permute.xlu0 %1354  ;;  %v1484_v35 = vld [vmem:[%s1871_s24] sm:$0xff]  ;;  %v1490_v1 = vld [vmem:[%s1871_s24 + $0x30] sm:$0xff] }
 0x2af   : > { %v1361_v13 = vpop.permute.xlu1 %1360  ;;  %1558 = vmatprep.subr.mxu1 %v1229_v39 }
 0x2b0   : > { %1559 = vmatpush2.msra.mxu1 %v1228_v38 }
 0x2b1   : > { %1560 = vmatprep.subr.mxu1 %v2338_v63  ;;  %v1353_v53 = vpop.permute.xlu0 %1352 }
 0x2b2   : > { %1561 = vmatpush2.msra.mxu1 %v2334_v3  ;;  %v1370_v20 = vsel %vm638_vm7, %v1361_v13, %v1353_v53  ;;  %v1366_v3 = vsel %vm638_vm7, %v1353_v53, %v1361_v13 }
 0x2b3   : > { %v1363_v33 = vpop.permute.xlu1 %1362  ;;  %1562 = vmatprep.subr.mxu1 %v2312_v56  ;;  %v1389_v56 = vmul.f32 %v1381_v32, %v1370_v20 }
 0x2b4   : > { %v1367_v28 = vsel %vm638_vm7, %v1355_v9, %v1363_v33  ;;  %v1371_v29 = vsel %vm638_vm7, %v1363_v33, %v1355_v9  ;;  %1563 = vmatpush2.msra.mxu1 %v2308_v55  ;;  %v1388_v55 = vmul.f32 %v1377_v59, %v1366_v3 }
 0x2b5   : > { %v1390_v11 = vmul.f32 %v1377_v59, %v1367_v28  ;;  %v1391_v63 = vmul.f32 %v1381_v32, %v1371_v29  ;;  %1564 = vmatprep.subr.mxu1 %v2290_v46  ;;  %v1351_v12 = vpop.permute.xlu0 %1350 }
 0x2b6   : > { %1565 = vmatpush2.msra.mxu1 %v2286_v45 }
 0x2b7   : > { %v1359_v4 = vpop.permute.xlu1 %1358  ;;  %1566 = vmatprep.subr.mxu1 %v2268_v36  ;;  %1617 = vmatprep.subr.mxu0 %v1391_v63  ;;  %v1404_v36 = vld [vmem:[%s2737_s2 + $0x20] sm:$0xff] }
 0x2b8   : > { %v1365_v21 = vsel %vm638_vm7, %v1351_v12, %v1359_v4  ;;  %v1369_v24 = vsel %vm638_vm7, %v1359_v4, %v1351_v12  ;;  %1567 = vmatpush2.msra.mxu1 %v2263_v34  ;;  %1618 = vmatpush1.msra.mxu0 %v1390_v11 }
 0x2b9   : > { %v1386_v45 = vmul.f32 %v1377_v59, %v1365_v21  ;;  %v1387_v46 = vmul.f32 %v1381_v32, %v1369_v24  ;;  %1780 = vmatprep.subr.mxu1 %v1391_v63  ;;  %1619 = vmatprep.subr.mxu0 %v1389_v56  ;;  %v1349_v25 = vpop.permute.xlu0 %1348 }
 0x2ba   : > { %1569 = vmatmul.mubr.f32.vlgmr.msra.gmra.mxu1 %v1400_v48  ;;  %1620 = vmatpush1.msra.mxu0 %v1388_v55 }
 0x2bb   : > { %1784 = vmatpush1.msra.mxu1 %v1390_v11  ;;  %v1357_v5 = vpop.permute.xlu1 %1356  ;;  %1621 = vmatprep.subr.mxu0 %v1387_v46 }
 0x2bc   : > { %v1364_v34 = vsel %vm638_vm7, %v1349_v25, %v1357_v5  ;;  %v1368_v41 = vsel %vm638_vm7, %v1357_v5, %v1349_v25  ;;  %1781 = vmatprep.subr.mxu1 %v1389_v56  ;;  %1622 = vmatpush1.msra.mxu0 %v1386_v45 }
 0x2bd   : > { %v1384_v43 = vmul.f32 %v1377_v59, %v1364_v34  ;;  %v1385_v14 = vmul.f32 %v1381_v32, %v1368_v41  ;;  %1785 = vmatpush1.msra.mxu1 %v1388_v55  ;;  %1574 = vmatprep.mubr.f32.mxu1 %v1404_v36 }
 0x2be   : > { %1782 = vmatprep.subr.mxu1 %v1387_v46  ;;  %1575 = vmatmul.mubr.f32.gmra.mxu1 %v1403_v40 }
 0x2bf   : > { %1786 = vmatpush1.msra.mxu1 %v1386_v45  ;;  %1623 = vmatprep.subr.mxu0 %v1385_v14 }
 0x2c0   : > { %1783 = vmatprep.subr.mxu1 %v1385_v14  ;;  %1624 = vmatpush1.msra.mxu0 %v1384_v43 }
 0x2c1   : > { %1787 = vmatpush1.msra.mxu1 %v1384_v43  ;;  %1772 = vmatmul.mubr.msk.f32.vlgmr.msra.gmra.mxu0 %vm760_vm8, %v1402_v42 }
 0x2c2   : > { %1580 = vmatprep.mubr.f32.mxu1 %v1407_v44  ;;  %1663 = vmatprep.mubr.f32.mxu0 %v1821_v19 }
 0x2c3   : > { %1581 = vmatmul.mubr.f32.gmra.mxu1 %v1406_v10 }
 0x2c4   : > { %1586 = vmatprep.mubr.f32.mxu1 %v1410_v16 }
 0x2c5   : > { %1773 = vmatmul.mubr.msk.f32.gmra.mxu0 %vm760_vm8, %v1405_v15 }
 0x2c6   : > { %1669 = vmatprep.mubr.f32.mxu0 %v1821_v19 }
 0x2c7   : > { %1587 = vmatmul.mubr.f32.gmra.mxu1 %v1409_v47 }
 0x2c8   : > { %1675 = vmatprep.mubr.f32.mxu1 %v1821_v19 }
 0x2c9   : > { %1774 = vmatmul.mubr.msk.f32.gmra.mxu0 %vm760_vm8, %v1408_v30 }
 0x2cb   : > { %1775 = vmatmul.mubr.msk.f32.vlgmr.msra.gmra.mxu1 %vm760_vm8, %v1411_v31 }
 0x37a   : > { %v1570_v49 = vpop.f32.mrf.mxu1 }
 0x37b   : > { %v1571_v50 = vadd.f32 %v1570_v49, %v1484_v35 }
 0x37c   : > { %v1572_v22 = vpop.f32.mrf.mxu1 }
 0x37d   : > { %v1573_v26 = vadd.f32 %v1572_v22, %v1485_v23 }
 0x37e   : > { %v1576_v37 = vpop.f32.mrf.mxu1 }
 0x37f   : > { %v1577_v60 = vadd.f32 %v1576_v37, %v1486_v52 }
 0x380   : > { %v1578_v51 = vpop.f32.mrf.mxu1 }
 0x381   : > { %v1659_v19 = vpop.f32.mrf.mxu0  ;;  %v1579_v6 = vadd.f32 %v1578_v51, %v1487_v54 }
 0x382   : > { %v1660_v27 = vadd.f32 %v1659_v19, %v1571_v50 }
 0x383   : > { %v1661_v57 = vpop.f32.mrf.mxu0  ;;  %v1582_v58 = vpop.f32.mrf.mxu1 }
 0x384   : > { %1682 = vst [vmem:[%s2717_s19] sm:$0xff] %v1660_v27  ;;  %v1662_v17 = vadd.f32 %v1661_v57, %v1573_v26  ;;  %v1583_v39 = vadd.f32 %v1582_v58, %v1488_v61 }
 0x385   : > { %v1665_v8 = vpop.f32.mrf.mxu0  ;;  %v1584_v18 = vpop.f32.mrf.mxu1 }
 0x386   : > { %1683 = vst [vmem:[%s2717_s19 + $0x8] sm:$0xff] %v1662_v17  ;;  %v1666_v62 = vadd.f32 %v1665_v8, %v1577_v60  ;;  %v1585_v59 = vadd.f32 %v1584_v18, %v1489_v0 }
 0x387   : > { %v1667_v2 = vpop.f32.mrf.mxu0  ;;  %v1588_v38 = vpop.f32.mrf.mxu1 }
 0x388   : > { %1684 = vst [vmem:[%s2717_s19 + $0x10] sm:$0xff] %v1666_v62  ;;  %v1668_v9 = vadd.f32 %v1667_v2, %v1579_v6  ;;  %v1589_v32 = vadd.f32 %v1588_v38, %v1490_v1 }
 0x389   : > { %v1671_v13 = vpop.f32.mrf.mxu0  ;;  %v1590_v53 = vpop.f32.mrf.mxu1 }
 0x38a   : > { %1685 = vst [vmem:[%s2717_s19 + $0x18] sm:$0xff] %v1668_v9  ;;  %v1672_v33 = vadd.f32 %v1671_v13, %v1583_v39  ;;  %v1591_v29 = vadd.f32 %v1590_v53, %v1491_v7 }
 0x38b   : > { %v1673_v20 = vpop.f32.mrf.mxu0  ;;  %v1677_v28 = vpop.f32.mrf.mxu1 }
 0x38c   : > { %1686 = vst [vmem:[%s2717_s19 + $0x20] sm:$0xff] %v1672_v33  ;;  %v1674_v3 = vadd.f32 %v1673_v20, %v1585_v59  ;;  %v1678_v11 = vadd.f32 %v1677_v28, %v1589_v32 }
 0x38d   : > { %v1679_v63 = vpop.f32.mrf.mxu1 }
 0x38e   : > { %1687 = vst [vmem:[%s2717_s19 + $0x28] sm:$0xff] %v1674_v3  ;;  %1688 = vst [vmem:[%s2717_s19 + $0x30] sm:$0xff] %v1678_v11  ;;  %v1680_v12 = vadd.f32 %v1679_v63, %v1591_v29 }
 0x390   : > { %1689 = vst [vmem:[%s2717_s19 + $0x38] sm:$0xff] %v1680_v12 }
 0x391 PF: > { %s16_s20 = sadd.s32 1, %s1811_s20  }
 0x392   : > { %p13_p4 = scmp.ge.s32.totalorder %s16_s20, 4  }
 0x394   :  { %15 = sbr.rel (!%p13_p4) target bundleno = 2 (0x2), region = 77 }

</bundles_post_ra>
